<compile_context>
chip_gen: v7x
topology: tpu7x:2x2x1
jax: 0.10.0
libtpu: 0.0.40
codegen_flags: <defaults>
</compile_context>

<pallas_src>
import math

import numpy as np
import jax
import jax.numpy as jnp
from jax import lax
from jax.experimental import pallas as pl
from jax.experimental.pallas import tpu as pltpu


def _round_up(x, m):
    return ((x + m - 1) // m) * m


# ----------------------------- Pallas kernel ---------------------------------

def _make_deit_attention_kernel(*, num_heads, head_dim, seq_len, q_tile,
                                has_head_mask, emit_probs, approx_recip):
    H = num_heads * head_dim
    S = seq_len
    tq = q_tile

    def kernel(*refs):
        it = iter(refs)
        hm_ref = next(it) if has_head_mask else None       # SMEM (num_heads,) f32
        x_ref = next(it)                                    # (1, S, H)   compute dtype
        wqkv_ref = next(it)                                 # (H, 3H)     compute dtype (Q cols pre-scaled)
        bqkv_ref = next(it)                                 # (1, 3H)     f32           (Q cols pre-scaled)
        wo_ref = next(it)                                   # (H, H)      compute dtype
        bo_ref = next(it)                                   # (1, H)      f32
        out_ref = next(it)                                  # (1, tq, H)
        probs_ref = next(it) if emit_probs else None        # (1, nH, tq, probs_pad) f32
        qkv_sc = next(it)                                   # (S_pad, 3H) compute dtype, persistent per batch
        ctx_sc = next(it)                                   # (tq, H)     compute dtype

        qi = pl.program_id(1)
        cdt = qkv_sc.dtype

        # Fused QKV projection, computed once per batch element (first q-tile) and kept resident
        # in VMEM scratch across all q-tile steps of that batch element.
        @pl.when(qi == 0)
        def _():
            qkv = jnp.dot(x_ref[0], wqkv_ref[...], preferred_element_type=jnp.float32)
            qkv = qkv + bqkv_ref[0]                         # (S, 3H) f32
            qkv_sc[0:S, :] = qkv.astype(cdt)                # single f32 -> compute-dtype cast

        q0 = pl.multiple_of(qi * tq, tq)                    # query-tile row offset into the scratch

        # Static head loop (static lane slices are guaranteed to lower; see TODO above).
        for h in range(num_heads):
            lo = h * head_dim
            qh = qkv_sc[pl.ds(q0, tq), lo:lo + head_dim]                # (tq, dH), already scaled
            kh = qkv_sc[0:S, H + lo:H + lo + head_dim]                  # (S,  dH)
            vh = qkv_sc[0:S, 2 * H + lo:2 * H + lo + head_dim]          # (S,  dH)

            # scores = q @ k^T (contract head_dim, no explicit transpose), f32 accumulation.
            scores = lax.dot_general(qh, kh, (((1,), (1,)), ((), ())),
                                     preferred_element_type=jnp.float32)   # (tq, S)

            # Numerically-stable softmax over keys (f32); divide on the EUP via reciprocal.
            m = jnp.max(scores, axis=-1, keepdims=True)
            e = jnp.exp(scores - m)
            p = e * pl.reciprocal(jnp.sum(e, axis=-1, keepdims=True), approx=approx_recip)

            if has_head_mask:
                p = p * hm_ref[h]                            # per-head scalar from SMEM (post-softmax)

            if emit_probs:
                # Sliced store (no pad concat). Columns [S:probs_pad] are never written; the
                # wrapper slices them off and never reads them (documented invariant).
                probs_ref[0, h, :, 0:S] = p

            ctx_h = jnp.dot(p.astype(cdt), vh, preferred_element_type=jnp.float32)   # (tq, dH)
            ctx_sc[:, lo:lo + head_dim] = ctx_h.astype(cdt)

        # SelfOutput dense on the merged context (residual add happens in DeiTLayer, not here).
        out = jnp.dot(ctx_sc[...], wo_ref[...], preferred_element_type=jnp.float32) + bo_ref[0]
        out_ref[0] = out.astype(out_ref.dtype)

    return kernel


# ------------------------------ Wrapper ---------------------------------------

def tt_deit_attention(hidden_states, params, head_mask=None, output_attentions=False,
                      *, num_heads, compute_dtype=jnp.bfloat16, q_tile=128):
    B, S, H = hidden_states.shape
    assert H % num_heads == 0
    head_dim = H // num_heads
    cdt = jnp.dtype(compute_dtype)
    out_dtype = hidden_states.dtype

    has_head_mask = head_mask is not None
    emit_probs = bool(output_attentions)
    probs_pad = _round_up(S, 128)            # lane-dense probs writeback; wrapper slices [..., :S]

    # Query tiling: per step the live set is (tq, S) scores per head instead of (S, S).
    tq = S if S <= q_tile else q_tile
    n_q = (S + tq - 1) // tq
    s_pad = n_q * tq                          # scratch rows (>= S) so in-kernel q slices stay in bounds

    # Fold 1/sqrt(head_dim) into the Q projection; fuse Q/K/V into a single (H, 3H) matmul.
    scale = 1.0 / math.sqrt(head_dim)
    wqkv = jnp.concatenate([params["wq"] * scale, params["wk"], params["wv"]], axis=1).astype(cdt)
    bqkv = jnp.concatenate([params["bq"] * scale, params["bk"], params["bv"]], axis=1).astype(jnp.float32)
    wo = params["wo"].astype(cdt)
    bo = params["bo"].astype(jnp.float32)
    x = hidden_states.astype(cdt)

    kernel = _make_deit_attention_kernel(
        num_heads=num_heads, head_dim=head_dim, seq_len=S, q_tile=tq,
        has_head_mask=has_head_mask, emit_probs=emit_probs,
        approx_recip=(cdt == jnp.dtype(jnp.bfloat16)))

    # ---- VMEM budget & limit (always set; capped at device capacity) --------
    wbytes = cdt.itemsize
    obytes = jnp.dtype(out_dtype).itemsize
    vmem_est = (
        2 * S * H * wbytes                                    # x block (double-buffered)
        + (3 * H * H + H * H) * wbytes + 4 * H * 4            # weights/biases (single-buffered)
        + 2 * tq * H * obytes                                  # out block (double-buffered)
        + s_pad * 3 * H * wbytes + tq * H * wbytes             # persistent QKV slab + ctx scratch
        + S * 3 * H * 4                                        # f32 qkv intermediate at q-tile 0
        + 4 * tq * probs_pad * 4                               # per-head f32 scores/probs headroom
    )
    if emit_probs:
        vmem_est += 2 * num_heads * tq * probs_pad * 4
    try:
        vmem_cap = int(pltpu.get_tpu_info().vmem_capacity_bytes)
    except Exception:
        vmem_cap = 64 * 1024 * 1024                            # conservative (v7x per-core capacity)
    vmem_limit = int(min(vmem_cap - 8 * 1024 * 1024,
                         max(vmem_est, 32 * 1024 * 1024)))

    # Advisory cost estimate so XLA overlaps the kernel well inside the full DeiT layer.
    flops = B * (2 * S * H * 3 * H + 4 * S * S * H + 2 * S * H * H)
    bytes_accessed = (B * S * H * (wbytes + obytes) + (4 * H * H) * wbytes
                      + (B * num_heads * S * probs_pad * 4 if emit_probs else 0))
    cost = pl.CostEstimate(flops=int(flops),
                           transcendentals=int(B * num_heads * S * S),
                           bytes_accessed=int(bytes_accessed))

    def _run(single_buffer_weights):
        def inv_spec(shape):
            # Grid-invariant block: fetched once; single-buffered to save VMEM when supported.
            if single_buffer_weights:
                return pl.BlockSpec(shape, lambda b, q: (0,) * len(shape),
                                    pipeline_mode=pl.Buffered(1))
            return pl.BlockSpec(shape, lambda b, q: (0,) * len(shape))

        in_specs, inputs = [], []
        if has_head_mask:
            in_specs.append(pl.BlockSpec(memory_space=pltpu.MemorySpace.SMEM))
            inputs.append(jnp.asarray(head_mask, jnp.float32).reshape(num_heads))
        in_specs += [
            pl.BlockSpec((1, S, H), lambda b, q: (b, 0, 0)),   # x: re-fetched only when b changes
            inv_spec((H, 3 * H)),                              # fused Wqkv (Q cols pre-scaled)
            inv_spec((1, 3 * H)),                              # fused bqkv (f32)
            inv_spec((H, H)),                                  # Wo
            inv_spec((1, H)),                                  # bo (f32)
        ]
        inputs += [x, wqkv, bqkv, wo, bo]

        out_shapes = [jax.ShapeDtypeStruct((B, S, H), out_dtype)]
        out_specs = [pl.BlockSpec((1, tq, H), lambda b, q: (b, q, 0))]
        if emit_probs:
            out_shapes.append(jax.ShapeDtypeStruct((B, num_heads, S, probs_pad), jnp.float32))
            out_specs.append(pl.BlockSpec((1, num_heads, tq, probs_pad),
                                          lambda b, q: (b, 0, q, 0)))

        return pl.pallas_call(
            kernel,
            out_shape=tuple(out_shapes),
            grid=(B, n_q),
            in_specs=in_specs,
            out_specs=tuple(out_specs),
            scratch_shapes=[pltpu.VMEM((s_pad, 3 * H), cdt),   # persistent fused-QKV slab (bf16)
                            pltpu.VMEM((tq, H), cdt)],         # per-tile merged context (bf16)
            compiler_params=pltpu.CompilerParams(
                # q-tile axis must stay sequential (it reuses the per-batch QKV scratch).
                dimension_semantics=("parallel", "arbitrary"),
                vmem_limit_bytes=vmem_limit),
            cost_estimate=cost,
        )(*inputs)

    use_single_buffer = hasattr(pl, "Buffered")
    try:
        results = _run(use_single_buffer)
    except Exception:
        if not use_single_buffer:
            raise
        results = _run(False)    # fall back to default double-buffered weights

    out = results[0]
    if emit_probs:
        return (out, results[1][..., :S])                      # drop lane padding (never written past S)
    return (out,)


# --------------------------- Pure-JAX reference --------------------------------

def ref_deit_attention(x, params, head_mask, num_heads):
    B, S, H = x.shape
    dH = H // num_heads
    q = x @ params["wq"] + params["bq"][0]
    k = x @ params["wk"] + params["bk"][0]
    v = x @ params["wv"] + params["bv"][0]

    def split(t):  # (B,S,H) -> (B,nH,S,dH)
        return t.reshape(B, S, num_heads, dH).transpose(0, 2, 1, 3)

    qh, kh, vh = split(q), split(k), split(v)
    scores = jnp.einsum("bhqd,bhkd->bhqk", qh, kh) / math.sqrt(dH)
    probs = jax.nn.softmax(scores, axis=-1)
    probs = probs * head_mask[None, :, None, None]
    ctx = jnp.einsum("bhqk,bhkd->bhqd", probs, vh)
    ctx = ctx.transpose(0, 2, 1, 3).reshape(B, S, H)
    out = ctx @ params["wo"] + params["bo"][0]
    return out, probs


# ---------------------------------- Main ---------------------------------------

if __name__ == "__main__":
    # Small DeiT-like config: hidden_size=32, num_attention_heads=4, seq=8, batch=2.
    B, S, H, NH = 2, 8, 32, 4

    key = jax.random.PRNGKey(0)
    ks = jax.random.split(key, 10)

    def winit(k):
        return jax.random.normal(k, (H, H), jnp.float32) * 0.05

    def binit(k):
        return jax.random.normal(k, (1, H), jnp.float32) * 0.05

    params = {
        "wq": winit(ks[0]), "bq": binit(ks[1]),
        "wk": winit(ks[2]), "bk": binit(ks[3]),
        "wv": winit(ks[4]), "bv": binit(ks[5]),
        "wo": winit(ks[6]), "bo": binit(ks[7]),
    }
    hidden_states = jax.random.normal(ks[8], (B, S, H), jnp.float32)

    # 1) Strict f32 path: output_attentions=True, no head mask -> tight tolerance.
    out_f32, probs_f32 = tt_deit_attention(
        hidden_states, params, head_mask=None, output_attentions=True,
        num_heads=NH, compute_dtype=jnp.float32)
    jax.block_until_ready(out_f32)
    jax.block_until_ready(probs_f32)

    ref_out, ref_probs = ref_deit_attention(
        hidden_states, params, jnp.ones((NH,), jnp.float32), NH)
    np.testing.assert_allclose(np.asarray(out_f32), np.asarray(ref_out),
                               rtol=1e-5, atol=1e-5)
    np.testing.assert_allclose(np.asarray(probs_f32), np.asarray(ref_probs),
                               rtol=1e-5, atol=1e-5)

    # 2) Default fast bf16 path: no probs writeback, with a head mask -> loose tolerance.
    hm = jnp.array([1.0, 0.5, 0.0, 1.0], jnp.float32)
    (out_bf16,) = tt_deit_attention(
        hidden_states, params, head_mask=hm, output_attentions=False, num_heads=NH)
    jax.block_until_ready(out_bf16)

    ref_out2, _ = ref_deit_attention(hidden_states, params, hm, NH)
    np.testing.assert_allclose(np.asarray(out_bf16), np.asarray(ref_out2),
                               rtol=5e-2, atol=5e-2)

    # 3) Multi-q-tile path (S > 128, not a tile multiple): exercises the persistent QKV scratch
    #    across q-tiles and the masked partial-tile writeback. f32, head mask, probs emitted.
    S3 = 200
    x3 = jax.random.normal(ks[9], (1, S3, H), jnp.float32)
    hm3 = jnp.array([1.0, 0.25, 0.0, 2.0], jnp.float32)
    out3, probs3 = tt_deit_attention(
        x3, params, head_mask=hm3, output_attentions=True,
        num_heads=NH, compute_dtype=jnp.float32)
    jax.block_until_ready(out3)
    jax.block_until_ready(probs3)

    ref_out3, ref_probs3 = ref_deit_attention(x3, params, hm3, NH)
    np.testing.assert_allclose(np.asarray(out3), np.asarray(ref_out3),
                               rtol=5e-4, atol=5e-4)
    np.testing.assert_allclose(np.asarray(probs3), np.asarray(ref_probs3),
                               rtol=5e-4, atol=5e-4)

    print("KERNEL_OK")
</pallas_src>

<mosaic_0001>
module attributes {stable_mosaic.version = 11 : i64} {
  func.func @kernel(%arg0: i32, %arg1: i32, %arg2: memref<1x8x32xf32, #tpu.memory_space<vmem>>, %arg3: memref<32x96xf32, #tpu.memory_space<vmem>>, %arg4: memref<1x96xf32, #tpu.memory_space<vmem>>, %arg5: memref<32x32xf32, #tpu.memory_space<vmem>>, %arg6: memref<1x32xf32, #tpu.memory_space<vmem>>, %arg7: memref<1x8x32xf32, #tpu.memory_space<vmem>>, %arg8: memref<1x4x8x128xf32, #tpu.memory_space<vmem>>, %arg9: memref<8x96xf32, #tpu.memory_space<vmem>>, %arg10: memref<8x32xf32, #tpu.memory_space<vmem>>) attributes {dimension_semantics = [#tpu.dimension_semantics<parallel>, #tpu.dimension_semantics<arbitrary>], iteration_bounds = array<i64: 2, 1>, scalar_prefetch = 0 : i64, scratch_operands = 2 : i64, tpu.core_type = #tpu.core_type<tc>, window_params = [{transform_indices = @transform_0, window_bounds = array<i64: 1, 8, 32>}, {pipeline_mode = #tpu.pipeline_mode<synchronous>, transform_indices = @transform_1, window_bounds = array<i64: 32, 96>}, {pipeline_mode = #tpu.pipeline_mode<synchronous>, transform_indices = @transform_2, window_bounds = array<i64: 1, 96>}, {pipeline_mode = #tpu.pipeline_mode<synchronous>, transform_indices = @transform_3, window_bounds = array<i64: 32, 32>}, {pipeline_mode = #tpu.pipeline_mode<synchronous>, transform_indices = @transform_4, window_bounds = array<i64: 1, 32>}, {transform_indices = @transform_5, window_bounds = array<i64: 1, 8, 32>}, {transform_indices = @transform_6, window_bounds = array<i64: 1, 4, 8, 128>}]} {
    %c0_i32 = arith.constant 0 : i32
    %0 = arith.cmpi eq, %arg1, %c0_i32 : i32
    %1 = arith.extui %0 : i1 to i32
    %c0_i32_0 = arith.constant 0 : i32
    %2 = arith.cmpi ne, %1, %c0_i32_0 : i32
    scf.if %2 {
      %c0_55 = arith.constant 0 : index
      %c0_56 = arith.constant 0 : index
      %c0_57 = arith.constant 0 : index
      %96 = vector.load %arg2[%c0_55, %c0_56, %c0_57] : memref<1x8x32xf32, #tpu.memory_space<vmem>>, vector<1x8x32xf32>
      %97 = vector.shape_cast %96 : vector<1x8x32xf32> to vector<8x32xf32>
      %c0_58 = arith.constant 0 : index
      %c0_59 = arith.constant 0 : index
      %98 = vector.load %arg3[%c0_58, %c0_59] : memref<32x96xf32, #tpu.memory_space<vmem>>, vector<32x96xf32>
      %cst_60 = arith.constant dense<0.000000e+00> : vector<8x96xf32>
      %99 = tpu.matmul %97, %98, %cst_60 {dimension_numbers = #tpu.dot_dimension_numbers<[1], [0], [0], [1], [0, 0, 1, 1], [], []>} : vector<8x32xf32>, vector<32x96xf32>, vector<8x96xf32> -> vector<8x96xf32>
      %c0_61 = arith.constant 0 : index
      %c0_62 = arith.constant 0 : index
      %100 = vector.load %arg4[%c0_61, %c0_62] : memref<1x96xf32, #tpu.memory_space<vmem>>, vector<1x96xf32>
      %101 = vector.shape_cast %100 : vector<1x96xf32> to vector<96xf32>
      %102 = vector.shape_cast %101 : vector<96xf32> to vector<1x96xf32>
      %103 = vector.broadcast %102 : vector<1x96xf32> to vector<8x96xf32>
      %104 = arith.addf %99, %103 : vector<8x96xf32>
      %c0_63 = arith.constant 0 : index
      %c0_64 = arith.constant 0 : index
      %105 = vector.load %arg9[%c0_63, %c0_64] : memref<8x96xf32, #tpu.memory_space<vmem>>, vector<8x96xf32>
      tpu.vector_store %arg9[%c0_63, %c0_64], %104 {strides = array<i32>} : memref<8x96xf32, #tpu.memory_space<vmem>>, vector<8x96xf32>,
    } else {
    }
    %c8_i32 = arith.constant 8 : i32
    %3 = arith.muli %arg1, %c8_i32 : i32
    %4 = tpu.assume_multiple %3, 8 : i32
    %5 = arith.index_cast %4 : i32 to index
    %c0 = arith.constant 0 : index
    %6 = vector.load %arg9[%5, %c0] : memref<8x96xf32, #tpu.memory_space<vmem>>, vector<8x8xf32>
    %c0_1 = arith.constant 0 : index
    %c32 = arith.constant 32 : index
    %7 = vector.load %arg9[%c0_1, %c32] : memref<8x96xf32, #tpu.memory_space<vmem>>, vector<8x8xf32>
    %c0_2 = arith.constant 0 : index
    %c64 = arith.constant 64 : index
    %8 = vector.load %arg9[%c0_2, %c64] : memref<8x96xf32, #tpu.memory_space<vmem>>, vector<8x8xf32>
    %cst = arith.constant dense<0.000000e+00> : vector<8x8xf32>
    %9 = tpu.matmul %6, %7, %cst {dimension_numbers = #tpu.dot_dimension_numbers<[1], [1], [0], [0], [0, 0, 1, 0], [], []>} : vector<8x8xf32>, vector<8x8xf32>, vector<8x8xf32> -> vector<8x8xf32>
    %cst_3 = arith.constant dense<0xFF800000> : vector<8xf32>
    %10 = vector.multi_reduction <maximumf>, %9, %cst_3 [1] : vector<8x8xf32> to vector<8xf32>
    %11 = vector.shape_cast %10 : vector<8xf32> to vector<8x1xf32>
    %12 = vector.broadcast %11 : vector<8x1xf32> to vector<8x8xf32>
    %13 = arith.subf %9, %12 : vector<8x8xf32>
    %14 = math.exp %13 : vector<8x8xf32>
    %cst_4 = arith.constant dense<0.000000e+00> : vector<8xf32>
    %15 = vector.multi_reduction <add>, %14, %cst_4 [1] : vector<8x8xf32> to vector<8xf32>
    %16 = vector.shape_cast %15 : vector<8xf32> to vector<8x1xf32>
    %17 = tpu.reciprocal %16 : vector<8x1xf32> -> vector<8x1xf32>
    %18 = vector.broadcast %17 : vector<8x1xf32> to vector<8x8xf32>
    %19 = arith.mulf %14, %18 : vector<8x8xf32>
    %c0_5 = arith.constant 0 : index
    %c0_6 = arith.constant 0 : index
    %c0_7 = arith.constant 0 : index
    %c0_8 = arith.constant 0 : index
    %20 = vector.load %arg8[%c0_5, %c0_6, %c0_7, %c0_8] : memref<1x4x8x128xf32, #tpu.memory_space<vmem>>, vector<1x1x8x8xf32>
    %21 = vector.shape_cast %20 : vector<1x1x8x8xf32> to vector<8x8xf32>
    %22 = vector.shape_cast %19 : vector<8x8xf32> to vector<1x1x8x8xf32>
    tpu.vector_store %arg8[%c0_5, %c0_6, %c0_7, %c0_8], %22 {strides = array<i32>} : memref<1x4x8x128xf32, #tpu.memory_space<vmem>>, vector<1x1x8x8xf32>,
    %cst_9 = arith.constant dense<0.000000e+00> : vector<8x8xf32>
    %23 = tpu.matmul %19, %8, %cst_9 {dimension_numbers = #tpu.dot_dimension_numbers<[1], [0], [0], [1], [0, 0, 1, 1], [], []>} : vector<8x8xf32>, vector<8x8xf32>, vector<8x8xf32> -> vector<8x8xf32>
    %c0_10 = arith.constant 0 : index
    %c0_11 = arith.constant 0 : index
    %24 = vector.load %arg10[%c0_10, %c0_11] : memref<8x32xf32, #tpu.memory_space<vmem>>, vector<8x8xf32>
    tpu.vector_store %arg10[%c0_10, %c0_11], %23 {strides = array<i32>} : memref<8x32xf32, #tpu.memory_space<vmem>>, vector<8x8xf32>,
    %25 = arith.index_cast %4 : i32 to index
    %c8 = arith.constant 8 : index
    %26 = vector.load %arg9[%25, %c8] : memref<8x96xf32, #tpu.memory_space<vmem>>, vector<8x8xf32>
    %c0_12 = arith.constant 0 : index
    %c40 = arith.constant 40 : index
    %27 = vector.load %arg9[%c0_12, %c40] : memref<8x96xf32, #tpu.memory_space<vmem>>, vector<8x8xf32>
    %c0_13 = arith.constant 0 : index
    %c72 = arith.constant 72 : index
    %28 = vector.load %arg9[%c0_13, %c72] : memref<8x96xf32, #tpu.memory_space<vmem>>, vector<8x8xf32>
    %cst_14 = arith.constant dense<0.000000e+00> : vector<8x8xf32>
    %29 = tpu.matmul %26, %27, %cst_14 {dimension_numbers = #tpu.dot_dimension_numbers<[1], [1], [0], [0], [0, 0, 1, 0], [], []>} : vector<8x8xf32>, vector<8x8xf32>, vector<8x8xf32> -> vector<8x8xf32>
    %cst_15 = arith.constant dense<0xFF800000> : vector<8xf32>
    %30 = vector.multi_reduction <maximumf>, %29, %cst_15 [1] : vector<8x8xf32> to vector<8xf32>
    %31 = vector.shape_cast %30 : vector<8xf32> to vector<8x1xf32>
    %32 = vector.broadcast %31 : vector<8x1xf32> to vector<8x8xf32>
    %33 = arith.subf %29, %32 : vector<8x8xf32>
    %34 = math.exp %33 : vector<8x8xf32>
    %cst_16 = arith.constant dense<0.000000e+00> : vector<8xf32>
    %35 = vector.multi_reduction <add>, %34, %cst_16 [1] : vector<8x8xf32> to vector<8xf32>
    %36 = vector.shape_cast %35 : vector<8xf32> to vector<8x1xf32>
    %37 = tpu.reciprocal %36 : vector<8x1xf32> -> vector<8x1xf32>
    %38 = vector.broadcast %37 : vector<8x1xf32> to vector<8x8xf32>
    %39 = arith.mulf %34, %38 : vector<8x8xf32>
    %c0_17 = arith.constant 0 : index
    %c1 = arith.constant 1 : index
    %c0_18 = arith.constant 0 : index
    %c0_19 = arith.constant 0 : index
    %40 = vector.load %arg8[%c0_17, %c1, %c0_18, %c0_19] : memref<1x4x8x128xf32, #tpu.memory_space<vmem>>, vector<1x1x8x8xf32>
    %41 = vector.shape_cast %40 : vector<1x1x8x8xf32> to vector<8x8xf32>
    %42 = vector.shape_cast %39 : vector<8x8xf32> to vector<1x1x8x8xf32>
    tpu.vector_store %arg8[%c0_17, %c1, %c0_18, %c0_19], %42 {strides = array<i32>} : memref<1x4x8x128xf32, #tpu.memory_space<vmem>>, vector<1x1x8x8xf32>,
    %cst_20 = arith.constant dense<0.000000e+00> : vector<8x8xf32>
    %43 = tpu.matmul %39, %28, %cst_20 {dimension_numbers = #tpu.dot_dimension_numbers<[1], [0], [0], [1], [0, 0, 1, 1], [], []>} : vector<8x8xf32>, vector<8x8xf32>, vector<8x8xf32> -> vector<8x8xf32>
    %c0_21 = arith.constant 0 : index
    %c8_22 = arith.constant 8 : index
    %44 = vector.load %arg10[%c0_21, %c8_22] : memref<8x32xf32, #tpu.memory_space<vmem>>, vector<8x8xf32>
    tpu.vector_store %arg10[%c0_21, %c8_22], %43 {strides = array<i32>} : memref<8x32xf32, #tpu.memory_space<vmem>>, vector<8x8xf32>,
    %45 = arith.index_cast %4 : i32 to index
    %c16 = arith.constant 16 : index
    %46 = vector.load %arg9[%45, %c16] : memref<8x96xf32, #tpu.memory_space<vmem>>, vector<8x8xf32>
    %c0_23 = arith.constant 0 : index
    %c48 = arith.constant 48 : index
    %47 = vector.load %arg9[%c0_23, %c48] : memref<8x96xf32, #tpu.memory_space<vmem>>, vector<8x8xf32>
    %c0_24 = arith.constant 0 : index
    %c80 = arith.constant 80 : index
    %48 = vector.load %arg9[%c0_24, %c80] : memref<8x96xf32, #tpu.memory_space<vmem>>, vector<8x8xf32>
    %cst_25 = arith.constant dense<0.000000e+00> : vector<8x8xf32>
    %49 = tpu.matmul %46, %47, %cst_25 {dimension_numbers = #tpu.dot_dimension_numbers<[1], [1], [0], [0], [0, 0, 1, 0], [], []>} : vector<8x8xf32>, vector<8x8xf32>, vector<8x8xf32> -> vector<8x8xf32>
    %cst_26 = arith.constant dense<0xFF800000> : vector<8xf32>
    %50 = vector.multi_reduction <maximumf>, %49, %cst_26 [1] : vector<8x8xf32> to vector<8xf32>
    %51 = vector.shape_cast %50 : vector<8xf32> to vector<8x1xf32>
    %52 = vector.broadcast %51 : vector<8x1xf32> to vector<8x8xf32>
    %53 = arith.subf %49, %52 : vector<8x8xf32>
    %54 = math.exp %53 : vector<8x8xf32>
    %cst_27 = arith.constant dense<0.000000e+00> : vector<8xf32>
    %55 = vector.multi_reduction <add>, %54, %cst_27 [1] : vector<8x8xf32> to vector<8xf32>
    %56 = vector.shape_cast %55 : vector<8xf32> to vector<8x1xf32>
    %57 = tpu.reciprocal %56 : vector<8x1xf32> -> vector<8x1xf32>
    %58 = vector.broadcast %57 : vector<8x1xf32> to vector<8x8xf32>
    %59 = arith.mulf %54, %58 : vector<8x8xf32>
    %c0_28 = arith.constant 0 : index
    %c2 = arith.constant 2 : index
    %c0_29 = arith.constant 0 : index
    %c0_30 = arith.constant 0 : index
    %60 = vector.load %arg8[%c0_28, %c2, %c0_29, %c0_30] : memref<1x4x8x128xf32, #tpu.memory_space<vmem>>, vector<1x1x8x8xf32>
    %61 = vector.shape_cast %60 : vector<1x1x8x8xf32> to vector<8x8xf32>
    %62 = vector.shape_cast %59 : vector<8x8xf32> to vector<1x1x8x8xf32>
    tpu.vector_store %arg8[%c0_28, %c2, %c0_29, %c0_30], %62 {strides = array<i32>} : memref<1x4x8x128xf32, #tpu.memory_space<vmem>>, vector<1x1x8x8xf32>,
    %cst_31 = arith.constant dense<0.000000e+00> : vector<8x8xf32>
    %63 = tpu.matmul %59, %48, %cst_31 {dimension_numbers = #tpu.dot_dimension_numbers<[1], [0], [0], [1], [0, 0, 1, 1], [], []>} : vector<8x8xf32>, vector<8x8xf32>, vector<8x8xf32> -> vector<8x8xf32>
    %c0_32 = arith.constant 0 : index
    %c16_33 = arith.constant 16 : index
    %64 = vector.load %arg10[%c0_32, %c16_33] : memref<8x32xf32, #tpu.memory_space<vmem>>, vector<8x8xf32>
    tpu.vector_store %arg10[%c0_32, %c16_33], %63 {strides = array<i32>} : memref<8x32xf32, #tpu.memory_space<vmem>>, vector<8x8xf32>,
    %65 = arith.index_cast %4 : i32 to index
    %c24 = arith.constant 24 : index
    %66 = vector.load %arg9[%65, %c24] : memref<8x96xf32, #tpu.memory_space<vmem>>, vector<8x8xf32>
    %c0_34 = arith.constant 0 : index
    %c56 = arith.constant 56 : index
    %67 = vector.load %arg9[%c0_34, %c56] : memref<8x96xf32, #tpu.memory_space<vmem>>, vector<8x8xf32>
    %c0_35 = arith.constant 0 : index
    %c88 = arith.constant 88 : index
    %68 = vector.load %arg9[%c0_35, %c88] : memref<8x96xf32, #tpu.memory_space<vmem>>, vector<8x8xf32>
    %cst_36 = arith.constant dense<0.000000e+00> : vector<8x8xf32>
    %69 = tpu.matmul %66, %67, %cst_36 {dimension_numbers = #tpu.dot_dimension_numbers<[1], [1], [0], [0], [0, 0, 1, 0], [], []>} : vector<8x8xf32>, vector<8x8xf32>, vector<8x8xf32> -> vector<8x8xf32>
    %cst_37 = arith.constant dense<0xFF800000> : vector<8xf32>
    %70 = vector.multi_reduction <maximumf>, %69, %cst_37 [1] : vector<8x8xf32> to vector<8xf32>
    %71 = vector.shape_cast %70 : vector<8xf32> to vector<8x1xf32>
    %72 = vector.broadcast %71 : vector<8x1xf32> to vector<8x8xf32>
    %73 = arith.subf %69, %72 : vector<8x8xf32>
    %74 = math.exp %73 : vector<8x8xf32>
    %cst_38 = arith.constant dense<0.000000e+00> : vector<8xf32>
    %75 = vector.multi_reduction <add>, %74, %cst_38 [1] : vector<8x8xf32> to vector<8xf32>
    %76 = vector.shape_cast %75 : vector<8xf32> to vector<8x1xf32>
    %77 = tpu.reciprocal %76 : vector<8x1xf32> -> vector<8x1xf32>
    %78 = vector.broadcast %77 : vector<8x1xf32> to vector<8x8xf32>
    %79 = arith.mulf %74, %78 : vector<8x8xf32>
    %c0_39 = arith.constant 0 : index
    %c3 = arith.constant 3 : index
    %c0_40 = arith.constant 0 : index
    %c0_41 = arith.constant 0 : index
    %80 = vector.load %arg8[%c0_39, %c3, %c0_40, %c0_41] : memref<1x4x8x128xf32, #tpu.memory_space<vmem>>, vector<1x1x8x8xf32>
    %81 = vector.shape_cast %80 : vector<1x1x8x8xf32> to vector<8x8xf32>
    %82 = vector.shape_cast %79 : vector<8x8xf32> to vector<1x1x8x8xf32>
    tpu.vector_store %arg8[%c0_39, %c3, %c0_40, %c0_41], %82 {strides = array<i32>} : memref<1x4x8x128xf32, #tpu.memory_space<vmem>>, vector<1x1x8x8xf32>,
    %cst_42 = arith.constant dense<0.000000e+00> : vector<8x8xf32>
    %83 = tpu.matmul %79, %68, %cst_42 {dimension_numbers = #tpu.dot_dimension_numbers<[1], [0], [0], [1], [0, 0, 1, 1], [], []>} : vector<8x8xf32>, vector<8x8xf32>, vector<8x8xf32> -> vector<8x8xf32>
    %c0_43 = arith.constant 0 : index
    %c24_44 = arith.constant 24 : index
    %84 = vector.load %arg10[%c0_43, %c24_44] : memref<8x32xf32, #tpu.memory_space<vmem>>, vector<8x8xf32>
    tpu.vector_store %arg10[%c0_43, %c24_44], %83 {strides = array<i32>} : memref<8x32xf32, #tpu.memory_space<vmem>>, vector<8x8xf32>,
    %c0_45 = arith.constant 0 : index
    %c0_46 = arith.constant 0 : index
    %85 = vector.load %arg10[%c0_45, %c0_46] : memref<8x32xf32, #tpu.memory_space<vmem>>, vector<8x32xf32>
    %c0_47 = arith.constant 0 : index
    %c0_48 = arith.constant 0 : index
    %86 = vector.load %arg5[%c0_47, %c0_48] : memref<32x32xf32, #tpu.memory_space<vmem>>, vector<32x32xf32>
    %cst_49 = arith.constant dense<0.000000e+00> : vector<8x32xf32>
    %87 = tpu.matmul %85, %86, %cst_49 {dimension_numbers = #tpu.dot_dimension_numbers<[1], [0], [0], [1], [0, 0, 1, 1], [], []>} : vector<8x32xf32>, vector<32x32xf32>, vector<8x32xf32> -> vector<8x32xf32>
    %c0_50 = arith.constant 0 : index
    %c0_51 = arith.constant 0 : index
    %88 = vector.load %arg6[%c0_50, %c0_51] : memref<1x32xf32, #tpu.memory_space<vmem>>, vector<1x32xf32>
    %89 = vector.shape_cast %88 : vector<1x32xf32> to vector<32xf32>
    %90 = vector.shape_cast %89 : vector<32xf32> to vector<1x32xf32>
    %91 = vector.broadcast %90 : vector<1x32xf32> to vector<8x32xf32>
    %92 = arith.addf %87, %91 : vector<8x32xf32>
    %c0_52 = arith.constant 0 : index
    %c0_53 = arith.constant 0 : index
    %c0_54 = arith.constant 0 : index
    %93 = vector.load %arg7[%c0_52, %c0_53, %c0_54] : memref<1x8x32xf32, #tpu.memory_space<vmem>>, vector<1x8x32xf32>
    %94 = vector.shape_cast %93 : vector<1x8x32xf32> to vector<8x32xf32>
    %95 = vector.shape_cast %92 : vector<8x32xf32> to vector<1x8x32xf32>
    tpu.vector_store %arg7[%c0_52, %c0_53, %c0_54], %95 {strides = array<i32>} : memref<1x8x32xf32, #tpu.memory_space<vmem>>, vector<1x8x32xf32>,
    return
  }
  func.func @transform_0(%arg0: i32, %arg1: i32) -> (i32, i32, i32) {
    %c0_i32 = arith.constant 0 : i32
    %c0_i32_0 = arith.constant 0 : i32
    %c0_i32_1 = arith.constant 0 : i32
    return %arg0, %c0_i32, %c0_i32_0 : i32, i32, i32
  }
  func.func @transform_1(%arg0: i32, %arg1: i32) -> (i32, i32) {
    %c0_i32 = arith.constant 0 : i32
    %c0_i32_0 = arith.constant 0 : i32
    %c0_i32_1 = arith.constant 0 : i32
    return %c0_i32, %c0_i32_0 : i32, i32
  }
  func.func @transform_2(%arg0: i32, %arg1: i32) -> (i32, i32) {
    %c0_i32 = arith.constant 0 : i32
    %c0_i32_0 = arith.constant 0 : i32
    %c0_i32_1 = arith.constant 0 : i32
    return %c0_i32, %c0_i32_0 : i32, i32
  }
  func.func @transform_3(%arg0: i32, %arg1: i32) -> (i32, i32) {
    %c0_i32 = arith.constant 0 : i32
    %c0_i32_0 = arith.constant 0 : i32
    %c0_i32_1 = arith.constant 0 : i32
    return %c0_i32, %c0_i32_0 : i32, i32
  }
  func.func @transform_4(%arg0: i32, %arg1: i32) -> (i32, i32) {
    %c0_i32 = arith.constant 0 : i32
    %c0_i32_0 = arith.constant 0 : i32
    %c0_i32_1 = arith.constant 0 : i32
    return %c0_i32, %c0_i32_0 : i32, i32
  }
  func.func @transform_5(%arg0: i32, %arg1: i32) -> (i32, i32, i32) {
    %c0_i32 = arith.constant 0 : i32
    %c0_i32_0 = arith.constant 0 : i32
    return %arg0, %arg1, %c0_i32 : i32, i32, i32
  }
  func.func @transform_6(%arg0: i32, %arg1: i32) -> (i32, i32, i32, i32) {
    %c0_i32 = arith.constant 0 : i32
    %c0_i32_0 = arith.constant 0 : i32
    %c0_i32_1 = arith.constant 0 : i32
    return %arg0, %c0_i32, %arg1, %c0_i32_0 : i32, i32, i32, i32
  }
}

module attributes {stable_mosaic.version = 11 : i64} {
  func.func @kernel(%arg0: i32, %arg1: i32, %arg2: memref<1x8x32xf32, #tpu.memory_space<vmem>>, %arg3: memref<32x96xf32, #tpu.memory_space<vmem>>, %arg4: memref<1x96xf32, #tpu.memory_space<vmem>>, %arg5: memref<32x32xf32, #tpu.memory_space<vmem>>, %arg6: memref<1x32xf32, #tpu.memory_space<vmem>>, %arg7: memref<1x8x32xf32, #tpu.memory_space<vmem>>, %arg8: memref<1x4x8x128xf32, #tpu.memory_space<vmem>>, %arg9: memref<8x96xf32, #tpu.memory_space<vmem>>, %arg10: memref<8x32xf32, #tpu.memory_space<vmem>>) attributes {dimension_semantics = [#tpu.dimension_semantics<parallel>, #tpu.dimension_semantics<arbitrary>], iteration_bounds = array<i64: 2, 1>, scalar_prefetch = 0 : i64, scratch_operands = 2 : i64, tpu.core_type = #tpu.core_type<tc>, window_params = [{transform_indices = @transform_0, window_bounds = array<i64: 1, 8, 32>}, {pipeline_mode = #tpu.pipeline_mode<synchronous>, transform_indices = @transform_1, window_bounds = array<i64: 32, 96>}, {pipeline_mode = #tpu.pipeline_mode<synchronous>, transform_indices = @transform_2, window_bounds = array<i64: 1, 96>}, {pipeline_mode = #tpu.pipeline_mode<synchronous>, transform_indices = @transform_3, window_bounds = array<i64: 32, 32>}, {pipeline_mode = #tpu.pipeline_mode<synchronous>, transform_indices = @transform_4, window_bounds = array<i64: 1, 32>}, {transform_indices = @transform_5, window_bounds = array<i64: 1, 8, 32>}, {transform_indices = @transform_6, window_bounds = array<i64: 1, 4, 8, 128>}]} {
    %c0_i32 = arith.constant 0 : i32
    %0 = arith.cmpi eq, %arg1, %c0_i32 : i32
    %1 = arith.extui %0 : i1 to i32
    %c0_i32_0 = arith.constant 0 : i32
    %2 = arith.cmpi ne, %1, %c0_i32_0 : i32
    scf.if %2 {
      %c0_55 = arith.constant 0 : index
      %c0_56 = arith.constant 0 : index
      %c0_57 = arith.constant 0 : index
      %96 = vector.load %arg2[%c0_55, %c0_56, %c0_57] : memref<1x8x32xf32, #tpu.memory_space<vmem>>, vector<1x8x32xf32>
      %97 = vector.shape_cast %96 : vector<1x8x32xf32> to vector<8x32xf32>
      %c0_58 = arith.constant 0 : index
      %c0_59 = arith.constant 0 : index
      %98 = vector.load %arg3[%c0_58, %c0_59] : memref<32x96xf32, #tpu.memory_space<vmem>>, vector<32x96xf32>
      %cst_60 = arith.constant dense<0.000000e+00> : vector<8x96xf32>
      %99 = tpu.matmul %97, %98, %cst_60 {dimension_numbers = #tpu.dot_dimension_numbers<[1], [0], [0], [1], [0, 0, 1, 1], [], []>} : vector<8x32xf32>, vector<32x96xf32>, vector<8x96xf32> -> vector<8x96xf32>
      %c0_61 = arith.constant 0 : index
      %c0_62 = arith.constant 0 : index
      %100 = vector.load %arg4[%c0_61, %c0_62] : memref<1x96xf32, #tpu.memory_space<vmem>>, vector<1x96xf32>
      %101 = vector.shape_cast %100 : vector<1x96xf32> to vector<96xf32>
      %102 = vector.shape_cast %101 : vector<96xf32> to vector<1x96xf32>
      %103 = vector.broadcast %102 : vector<1x96xf32> to vector<8x96xf32>
      %104 = arith.addf %99, %103 : vector<8x96xf32>
      %c0_63 = arith.constant 0 : index
      %c0_64 = arith.constant 0 : index
      %105 = vector.load %arg9[%c0_63, %c0_64] : memref<8x96xf32, #tpu.memory_space<vmem>>, vector<8x96xf32>
      tpu.vector_store %arg9[%c0_63, %c0_64], %104 {strides = array<i32>} : memref<8x96xf32, #tpu.memory_space<vmem>>, vector<8x96xf32>,
    } else {
    }
    %c8_i32 = arith.constant 8 : i32
    %3 = arith.muli %arg1, %c8_i32 : i32
    %4 = tpu.assume_multiple %3, 8 : i32
    %5 = arith.index_cast %4 : i32 to index
    %c0 = arith.constant 0 : index
    %6 = vector.load %arg9[%5, %c0] : memref<8x96xf32, #tpu.memory_space<vmem>>, vector<8x8xf32>
    %c0_1 = arith.constant 0 : index
    %c32 = arith.constant 32 : index
    %7 = vector.load %arg9[%c0_1, %c32] : memref<8x96xf32, #tpu.memory_space<vmem>>, vector<8x8xf32>
    %c0_2 = arith.constant 0 : index
    %c64 = arith.constant 64 : index
    %8 = vector.load %arg9[%c0_2, %c64] : memref<8x96xf32, #tpu.memory_space<vmem>>, vector<8x8xf32>
    %cst = arith.constant dense<0.000000e+00> : vector<8x8xf32>
    %9 = tpu.matmul %6, %7, %cst {dimension_numbers = #tpu.dot_dimension_numbers<[1], [1], [0], [0], [0, 0, 1, 0], [], []>} : vector<8x8xf32>, vector<8x8xf32>, vector<8x8xf32> -> vector<8x8xf32>
    %cst_3 = arith.constant dense<0xFF800000> : vector<8xf32>
    %10 = vector.multi_reduction <maximumf>, %9, %cst_3 [1] : vector<8x8xf32> to vector<8xf32>
    %11 = vector.shape_cast %10 : vector<8xf32> to vector<8x1xf32>
    %12 = vector.broadcast %11 : vector<8x1xf32> to vector<8x8xf32>
    %13 = arith.subf %9, %12 : vector<8x8xf32>
    %14 = math.exp %13 : vector<8x8xf32>
    %cst_4 = arith.constant dense<0.000000e+00> : vector<8xf32>
    %15 = vector.multi_reduction <add>, %14, %cst_4 [1] : vector<8x8xf32> to vector<8xf32>
    %16 = vector.shape_cast %15 : vector<8xf32> to vector<8x1xf32>
    %17 = tpu.reciprocal %16 : vector<8x1xf32> -> vector<8x1xf32>
    %18 = vector.broadcast %17 : vector<8x1xf32> to vector<8x8xf32>
    %19 = arith.mulf %14, %18 : vector<8x8xf32>
    %c0_5 = arith.constant 0 : index
    %c0_6 = arith.constant 0 : index
    %c0_7 = arith.constant 0 : index
    %c0_8 = arith.constant 0 : index
    %20 = vector.load %arg8[%c0_5, %c0_6, %c0_7, %c0_8] : memref<1x4x8x128xf32, #tpu.memory_space<vmem>>, vector<1x1x8x8xf32>
    %21 = vector.shape_cast %20 : vector<1x1x8x8xf32> to vector<8x8xf32>
    %22 = vector.shape_cast %19 : vector<8x8xf32> to vector<1x1x8x8xf32>
    tpu.vector_store %arg8[%c0_5, %c0_6, %c0_7, %c0_8], %22 {strides = array<i32>} : memref<1x4x8x128xf32, #tpu.memory_space<vmem>>, vector<1x1x8x8xf32>,
    %cst_9 = arith.constant dense<0.000000e+00> : vector<8x8xf32>
    %23 = tpu.matmul %19, %8, %cst_9 {dimension_numbers = #tpu.dot_dimension_numbers<[1], [0], [0], [1], [0, 0, 1, 1], [], []>} : vector<8x8xf32>, vector<8x8xf32>, vector<8x8xf32> -> vector<8x8xf32>
    %c0_10 = arith.constant 0 : index
    %c0_11 = arith.constant 0 : index
    %24 = vector.load %arg10[%c0_10, %c0_11] : memref<8x32xf32, #tpu.memory_space<vmem>>, vector<8x8xf32>
    tpu.vector_store %arg10[%c0_10, %c0_11], %23 {strides = array<i32>} : memref<8x32xf32, #tpu.memory_space<vmem>>, vector<8x8xf32>,
    %25 = arith.index_cast %4 : i32 to index
    %c8 = arith.constant 8 : index
    %26 = vector.load %arg9[%25, %c8] : memref<8x96xf32, #tpu.memory_space<vmem>>, vector<8x8xf32>
    %c0_12 = arith.constant 0 : index
    %c40 = arith.constant 40 : index
    %27 = vector.load %arg9[%c0_12, %c40] : memref<8x96xf32, #tpu.memory_space<vmem>>, vector<8x8xf32>
    %c0_13 = arith.constant 0 : index
    %c72 = arith.constant 72 : index
    %28 = vector.load %arg9[%c0_13, %c72] : memref<8x96xf32, #tpu.memory_space<vmem>>, vector<8x8xf32>
    %cst_14 = arith.constant dense<0.000000e+00> : vector<8x8xf32>
    %29 = tpu.matmul %26, %27, %cst_14 {dimension_numbers = #tpu.dot_dimension_numbers<[1], [1], [0], [0], [0, 0, 1, 0], [], []>} : vector<8x8xf32>, vector<8x8xf32>, vector<8x8xf32> -> vector<8x8xf32>
    %cst_15 = arith.constant dense<0xFF800000> : vector<8xf32>
    %30 = vector.multi_reduction <maximumf>, %29, %cst_15 [1] : vector<8x8xf32> to vector<8xf32>
    %31 = vector.shape_cast %30 : vector<8xf32> to vector<8x1xf32>
    %32 = vector.broadcast %31 : vector<8x1xf32> to vector<8x8xf32>
    %33 = arith.subf %29, %32 : vector<8x8xf32>
    %34 = math.exp %33 : vector<8x8xf32>
    %cst_16 = arith.constant dense<0.000000e+00> : vector<8xf32>
    %35 = vector.multi_reduction <add>, %34, %cst_16 [1] : vector<8x8xf32> to vector<8xf32>
    %36 = vector.shape_cast %35 : vector<8xf32> to vector<8x1xf32>
    %37 = tpu.reciprocal %36 : vector<8x1xf32> -> vector<8x1xf32>
    %38 = vector.broadcast %37 : vector<8x1xf32> to vector<8x8xf32>
    %39 = arith.mulf %34, %38 : vector<8x8xf32>
    %c0_17 = arith.constant 0 : index
    %c1 = arith.constant 1 : index
    %c0_18 = arith.constant 0 : index
    %c0_19 = arith.constant 0 : index
    %40 = vector.load %arg8[%c0_17, %c1, %c0_18, %c0_19] : memref<1x4x8x128xf32, #tpu.memory_space<vmem>>, vector<1x1x8x8xf32>
    %41 = vector.shape_cast %40 : vector<1x1x8x8xf32> to vector<8x8xf32>
    %42 = vector.shape_cast %39 : vector<8x8xf32> to vector<1x1x8x8xf32>
    tpu.vector_store %arg8[%c0_17, %c1, %c0_18, %c0_19], %42 {strides = array<i32>} : memref<1x4x8x128xf32, #tpu.memory_space<vmem>>, vector<1x1x8x8xf32>,
    %cst_20 = arith.constant dense<0.000000e+00> : vector<8x8xf32>
    %43 = tpu.matmul %39, %28, %cst_20 {dimension_numbers = #tpu.dot_dimension_numbers<[1], [0], [0], [1], [0, 0, 1, 1], [], []>} : vector<8x8xf32>, vector<8x8xf32>, vector<8x8xf32> -> vector<8x8xf32>
    %c0_21 = arith.constant 0 : index
    %c8_22 = arith.constant 8 : index
    %44 = vector.load %arg10[%c0_21, %c8_22] : memref<8x32xf32, #tpu.memory_space<vmem>>, vector<8x8xf32>
    tpu.vector_store %arg10[%c0_21, %c8_22], %43 {strides = array<i32>} : memref<8x32xf32, #tpu.memory_space<vmem>>, vector<8x8xf32>,
    %45 = arith.index_cast %4 : i32 to index
    %c16 = arith.constant 16 : index
    %46 = vector.load %arg9[%45, %c16] : memref<8x96xf32, #tpu.memory_space<vmem>>, vector<8x8xf32>
    %c0_23 = arith.constant 0 : index
    %c48 = arith.constant 48 : index
    %47 = vector.load %arg9[%c0_23, %c48] : memref<8x96xf32, #tpu.memory_space<vmem>>, vector<8x8xf32>
    %c0_24 = arith.constant 0 : index
    %c80 = arith.constant 80 : index
    %48 = vector.load %arg9[%c0_24, %c80] : memref<8x96xf32, #tpu.memory_space<vmem>>, vector<8x8xf32>
    %cst_25 = arith.constant dense<0.000000e+00> : vector<8x8xf32>
    %49 = tpu.matmul %46, %47, %cst_25 {dimension_numbers = #tpu.dot_dimension_numbers<[1], [1], [0], [0], [0, 0, 1, 0], [], []>} : vector<8x8xf32>, vector<8x8xf32>, vector<8x8xf32> -> vector<8x8xf32>
    %cst_26 = arith.constant dense<0xFF800000> : vector<8xf32>
    %50 = vector.multi_reduction <maximumf>, %49, %cst_26 [1] : vector<8x8xf32> to vector<8xf32>
    %51 = vector.shape_cast %50 : vector<8xf32> to vector<8x1xf32>
    %52 = vector.broadcast %51 : vector<8x1xf32> to vector<8x8xf32>
    %53 = arith.subf %49, %52 : vector<8x8xf32>
    %54 = math.exp %53 : vector<8x8xf32>
    %cst_27 = arith.constant dense<0.000000e+00> : vector<8xf32>
    %55 = vector.multi_reduction <add>, %54, %cst_27 [1] : vector<8x8xf32> to vector<8xf32>
    %56 = vector.shape_cast %55 : vector<8xf32> to vector<8x1xf32>
    %57 = tpu.reciprocal %56 : vector<8x1xf32> -> vector<8x1xf32>
    %58 = vector.broadcast %57 : vector<8x1xf32> to vector<8x8xf32>
    %59 = arith.mulf %54, %58 : vector<8x8xf32>
    %c0_28 = arith.constant 0 : index
    %c2 = arith.constant 2 : index
    %c0_29 = arith.constant 0 : index
    %c0_30 = arith.constant 0 : index
    %60 = vector.load %arg8[%c0_28, %c2, %c0_29, %c0_30] : memref<1x4x8x128xf32, #tpu.memory_space<vmem>>, vector<1x1x8x8xf32>
    %61 = vector.shape_cast %60 : vector<1x1x8x8xf32> to vector<8x8xf32>
    %62 = vector.shape_cast %59 : vector<8x8xf32> to vector<1x1x8x8xf32>
    tpu.vector_store %arg8[%c0_28, %c2, %c0_29, %c0_30], %62 {strides = array<i32>} : memref<1x4x8x128xf32, #tpu.memory_space<vmem>>, vector<1x1x8x8xf32>,
    %cst_31 = arith.constant dense<0.000000e+00> : vector<8x8xf32>
    %63 = tpu.matmul %59, %48, %cst_31 {dimension_numbers = #tpu.dot_dimension_numbers<[1], [0], [0], [1], [0, 0, 1, 1], [], []>} : vector<8x8xf32>, vector<8x8xf32>, vector<8x8xf32> -> vector<8x8xf32>
    %c0_32 = arith.constant 0 : index
    %c16_33 = arith.constant 16 : index
    %64 = vector.load %arg10[%c0_32, %c16_33] : memref<8x32xf32, #tpu.memory_space<vmem>>, vector<8x8xf32>
    tpu.vector_store %arg10[%c0_32, %c16_33], %63 {strides = array<i32>} : memref<8x32xf32, #tpu.memory_space<vmem>>, vector<8x8xf32>,
    %65 = arith.index_cast %4 : i32 to index
    %c24 = arith.constant 24 : index
    %66 = vector.load %arg9[%65, %c24] : memref<8x96xf32, #tpu.memory_space<vmem>>, vector<8x8xf32>
    %c0_34 = arith.constant 0 : index
    %c56 = arith.constant 56 : index
    %67 = vector.load %arg9[%c0_34, %c56] : memref<8x96xf32, #tpu.memory_space<vmem>>, vector<8x8xf32>
    %c0_35 = arith.constant 0 : index
    %c88 = arith.constant 88 : index
    %68 = vector.load %arg9[%c0_35, %c88] : memref<8x96xf32, #tpu.memory_space<vmem>>, vector<8x8xf32>
    %cst_36 = arith.constant dense<0.000000e+00> : vector<8x8xf32>
    %69 = tpu.matmul %66, %67, %cst_36 {dimension_numbers = #tpu.dot_dimension_numbers<[1], [1], [0], [0], [0, 0, 1, 0], [], []>} : vector<8x8xf32>, vector<8x8xf32>, vector<8x8xf32> -> vector<8x8xf32>
    %cst_37 = arith.constant dense<0xFF800000> : vector<8xf32>
    %70 = vector.multi_reduction <maximumf>, %69, %cst_37 [1] : vector<8x8xf32> to vector<8xf32>
    %71 = vector.shape_cast %70 : vector<8xf32> to vector<8x1xf32>
    %72 = vector.broadcast %71 : vector<8x1xf32> to vector<8x8xf32>
    %73 = arith.subf %69, %72 : vector<8x8xf32>
    %74 = math.exp %73 : vector<8x8xf32>
    %cst_38 = arith.constant dense<0.000000e+00> : vector<8xf32>
    %75 = vector.multi_reduction <add>, %74, %cst_38 [1] : vector<8x8xf32> to vector<8xf32>
    %76 = vector.shape_cast %75 : vector<8xf32> to vector<8x1xf32>
    %77 = tpu.reciprocal %76 : vector<8x1xf32> -> vector<8x1xf32>
    %78 = vector.broadcast %77 : vector<8x1xf32> to vector<8x8xf32>
    %79 = arith.mulf %74, %78 : vector<8x8xf32>
    %c0_39 = arith.constant 0 : index
    %c3 = arith.constant 3 : index
    %c0_40 = arith.constant 0 : index
    %c0_41 = arith.constant 0 : index
    %80 = vector.load %arg8[%c0_39, %c3, %c0_40, %c0_41] : memref<1x4x8x128xf32, #tpu.memory_space<vmem>>, vector<1x1x8x8xf32>
    %81 = vector.shape_cast %80 : vector<1x1x8x8xf32> to vector<8x8xf32>
    %82 = vector.shape_cast %79 : vector<8x8xf32> to vector<1x1x8x8xf32>
    tpu.vector_store %arg8[%c0_39, %c3, %c0_40, %c0_41], %82 {strides = array<i32>} : memref<1x4x8x128xf32, #tpu.memory_space<vmem>>, vector<1x1x8x8xf32>,
    %cst_42 = arith.constant dense<0.000000e+00> : vector<8x8xf32>
    %83 = tpu.matmul %79, %68, %cst_42 {dimension_numbers = #tpu.dot_dimension_numbers<[1], [0], [0], [1], [0, 0, 1, 1], [], []>} : vector<8x8xf32>, vector<8x8xf32>, vector<8x8xf32> -> vector<8x8xf32>
    %c0_43 = arith.constant 0 : index
    %c24_44 = arith.constant 24 : index
    %84 = vector.load %arg10[%c0_43, %c24_44] : memref<8x32xf32, #tpu.memory_space<vmem>>, vector<8x8xf32>
    tpu.vector_store %arg10[%c0_43, %c24_44], %83 {strides = array<i32>} : memref<8x32xf32, #tpu.memory_space<vmem>>, vector<8x8xf32>,
    %c0_45 = arith.constant 0 : index
    %c0_46 = arith.constant 0 : index
    %85 = vector.load %arg10[%c0_45, %c0_46] : memref<8x32xf32, #tpu.memory_space<vmem>>, vector<8x32xf32>
    %c0_47 = arith.constant 0 : index
    %c0_48 = arith.constant 0 : index
    %86 = vector.load %arg5[%c0_47, %c0_48] : memref<32x32xf32, #tpu.memory_space<vmem>>, vector<32x32xf32>
    %cst_49 = arith.constant dense<0.000000e+00> : vector<8x32xf32>
    %87 = tpu.matmul %85, %86, %cst_49 {dimension_numbers = #tpu.dot_dimension_numbers<[1], [0], [0], [1], [0, 0, 1, 1], [], []>} : vector<8x32xf32>, vector<32x32xf32>, vector<8x32xf32> -> vector<8x32xf32>
    %c0_50 = arith.constant 0 : index
    %c0_51 = arith.constant 0 : index
    %88 = vector.load %arg6[%c0_50, %c0_51] : memref<1x32xf32, #tpu.memory_space<vmem>>, vector<1x32xf32>
    %89 = vector.shape_cast %88 : vector<1x32xf32> to vector<32xf32>
    %90 = vector.shape_cast %89 : vector<32xf32> to vector<1x32xf32>
    %91 = vector.broadcast %90 : vector<1x32xf32> to vector<8x32xf32>
    %92 = arith.addf %87, %91 : vector<8x32xf32>
    %c0_52 = arith.constant 0 : index
    %c0_53 = arith.constant 0 : index
    %c0_54 = arith.constant 0 : index
    %93 = vector.load %arg7[%c0_52, %c0_53, %c0_54] : memref<1x8x32xf32, #tpu.memory_space<vmem>>, vector<1x8x32xf32>
    %94 = vector.shape_cast %93 : vector<1x8x32xf32> to vector<8x32xf32>
    %95 = vector.shape_cast %92 : vector<8x32xf32> to vector<1x8x32xf32>
    tpu.vector_store %arg7[%c0_52, %c0_53, %c0_54], %95 {strides = array<i32>} : memref<1x8x32xf32, #tpu.memory_space<vmem>>, vector<1x8x32xf32>,
    return
  }
  func.func @transform_0(%arg0: i32, %arg1: i32) -> (i32, i32, i32) {
    %c0_i32 = arith.constant 0 : i32
    %c0_i32_0 = arith.constant 0 : i32
    %c0_i32_1 = arith.constant 0 : i32
    return %arg0, %c0_i32, %c0_i32_0 : i32, i32, i32
  }
  func.func @transform_1(%arg0: i32, %arg1: i32) -> (i32, i32) {
    %c0_i32 = arith.constant 0 : i32
    %c0_i32_0 = arith.constant 0 : i32
    %c0_i32_1 = arith.constant 0 : i32
    return %c0_i32, %c0_i32_0 : i32, i32
  }
  func.func @transform_2(%arg0: i32, %arg1: i32) -> (i32, i32) {
    %c0_i32 = arith.constant 0 : i32
    %c0_i32_0 = arith.constant 0 : i32
    %c0_i32_1 = arith.constant 0 : i32
    return %c0_i32, %c0_i32_0 : i32, i32
  }
  func.func @transform_3(%arg0: i32, %arg1: i32) -> (i32, i32) {
    %c0_i32 = arith.constant 0 : i32
    %c0_i32_0 = arith.constant 0 : i32
    %c0_i32_1 = arith.constant 0 : i32
    return %c0_i32, %c0_i32_0 : i32, i32
  }
  func.func @transform_4(%arg0: i32, %arg1: i32) -> (i32, i32) {
    %c0_i32 = arith.constant 0 : i32
    %c0_i32_0 = arith.constant 0 : i32
    %c0_i32_1 = arith.constant 0 : i32
    return %c0_i32, %c0_i32_0 : i32, i32
  }
  func.func @transform_5(%arg0: i32, %arg1: i32) -> (i32, i32, i32) {
    %c0_i32 = arith.constant 0 : i32
    %c0_i32_0 = arith.constant 0 : i32
    return %arg0, %arg1, %c0_i32 : i32, i32, i32
  }
  func.func @transform_6(%arg0: i32, %arg1: i32) -> (i32, i32, i32, i32) {
    %c0_i32 = arith.constant 0 : i32
    %c0_i32_0 = arith.constant 0 : i32
    %c0_i32_1 = arith.constant 0 : i32
    return %arg0, %c0_i32, %arg1, %c0_i32_0 : i32, i32, i32, i32
  }
}

</mosaic_0001>

<bundles_post_ra>
// kernel: tpu_custom_call.1
= control target key start
LH: loop header
LB: loop body
LE: loop exit
PB: predicated region body
PF: predicated region fallthrough
CT: control target
= control target key end

     0   :  { %12 = vsyncpa [#allocation5], 0  ;;  %s2283_s0 = inlined_call_operand.hbm [shape: f32[2,8,32], index: 0, kind: input, shape index: {}]   ;;  %s2284_s1 = inlined_call_operand.hbm [shape: f32[32,96], index: 1, kind: input, shape index: {}]   ;;  %s2285_s2 = inlined_call_operand.vmem [shape: f32[1,96], index: 2, kind: input, shape index: {}]   ;;  %s2286_s3 = inlined_call_operand.hbm [shape: f32[32,32], index: 3, kind: input, shape index: {}]   ;;  %s2287_s4 = inlined_call_operand.vmem [shape: f32[1,32], index: 4, kind: input, shape index: {}]   ;;  %s2288_s5 = inlined_call_operand.hbm [shape: f32[2,8,32], index: 5, kind: output, shape index: {0}]   ;;  %s2289_s6 = inlined_call_operand.hbm [shape: f32[2,4,8,128], index: 6, kind: output, shape index: {1}]  }
   0x1   :  { %14 = vsyncpa [#allocation5 + $0x1], 0 }
   0x2   :  { %15 = vsyncpa [#allocation8], 0 }
   0x3   :  { %16 = vsyncpa [#allocation6], 0 }
   0x4   :  { %18 = vsyncpa [#allocation6 + $0x1], 0 }
   0x5   :  { %19 = vsyncpa [#allocation12], 0 }
   0x6   :  { %21 = vsyncpa [#allocation12 + $0x1], 0  ;;  %s1907_s21 = smov 0   ;;  %s1909_s22 = smov 0  }
   0x7   :  { %s1911_s23 = smov 0   ;;  %s1913_s24 = smov 0  }
   0x8   :  { %s1915_s25 = smov 0   ;;  %s1917_s26 = smov 0  }
   0x9 LB: > { %s1376_s27 = sadd.s32 4294967295, %s1845_s26   ;;  %s1377_s28 = sadd.s32 4294967294, %s1845_s26   ;;  %s1845_s26 = sphi %s1917_s26, %s27_s26   ;;  %s1841_s25 = sphi %s1915_s25, %s2314_s25   ;;  %s1837_s24 = sphi %s1913_s24, %s2313_s24   ;;  %s1833_s23 = sphi %s1911_s23, %s2312_s23   ;;  %s1829_s22 = sphi %s1909_s22, %s2311_s22   ;;  %s1825_s21 = sphi %s1907_s21, %s2310_s21  }
   0xa   : > { %p59_p0 = scmp.ne.s32.totalorder %s1829_s22, %s1825_s21  ;;  %p1941_p1 = scmp.eq.s32.totalorder %s1376_s27, 0 }
   0xb   : > { %p1945_p2 = scmp.eq.s32.totalorder %s1376_s27, 1  ;;  %p175_p3 = scmp.eq.s32.totalorder %s1377_s28, 1 }
   0xc   : > { %s2295_s29 = scalar_select %p1941_p1, 1, 0 }
   0xd   : > { %p1951_p4 = por %p1941_p1, %p59_p0  ;;  %p1378_p5 = scmp.ge.s32.totalorder %s1845_s26, 1 }
   0xe   : > { %p1956_p6 = por %p175_p3, %p59_p0  ;;  %p210_p7 = scmp.lt.s32.totalorder %s1845_s26, 3 }
   0xf   : > { %s2297_s7 = scalar_select %p1951_p4, 1, 0 }
  0x10   : > { %s2298_s8 = scalar_select %p1956_p6, 1, 0 }
  0x11   : > { %p1961_p8 = pnand %p1378_p5, %p210_p7  ;;  %s1847_s10 = smov [#allocation7]  }
  0x12   : > { %2299 = sst [smem:[#allocation17_spill]] %s2298_s8  ;;  %s222_s11 = sshll.u32 %s1847_s10, 4  ;;  %s1965_s11 = int_to_ptr.vmem [resolvable:$true] %s222_s11 }
  0x13   : > { %p1531_p9 = pneg %p1961_p8  ;;  %s1848_s13 = smov [#allocation9]  }
  0x14   : > { %s238_s14 = sshll.u32 %s1848_s13, 4  ;;  %s1641_s17 = scalar_lea.hbm %s2284_s1, 512  ;;  %s1976_s14 = int_to_ptr.vmem [resolvable:$true] %s238_s14 }
  0x15   : > { %p1972_p11 = pnand %p1531_p9, %p1941_p1  ;;  %p1642_p12 = scmp.ne.s32.totalorder %s2284_s1, %s1641_s17 }
  0x16   : > { %p1648_p5 = scmp.lt.u32.totalorder %s1641_s17, %s2284_s1 }
  0x17   : > { %p1643_p13 = pneg %p1972_p11 }
  0x19   : > { %p1644_p0 = pnand %p1643_p13, %p1642_p12 }
  0x1b   : > { %p1645_p3 = pneg %p1644_p0 }
  0x1d   : > { %p1650_p7 = pnand %p1648_p5, %p1645_p3 }
  0x1f   : > { %1653 = shalt.err (!%p1650_p7)
}
  0x20   : > { %s1654_s28 = scalar_lea.vmem %s1965_s11, 512  ;;  %p1662_p1 = scmp.lt.s32.totalorder %s1965_s11, %s1965_s11 }
  0x21   : > { %p1655_p9 = scmp.ne.s32.totalorder %s1965_s11, %s1654_s28  ;;  %p1663_p12 = scmp.lt.s32.totalorder %s1654_s28, %s1654_s28 }
  0x23   : > { %p1657_p10 = pnand %p1655_p9, %p1643_p13  ;;  %p1664_p0 = por %p1663_p12, %p1662_p1 }
  0x25   : > { %p1658_p6 = pneg %p1657_p10 }
  0x27   : > { %p1665_p4 = pnand %p1664_p0, %p1658_p6 }
  0x29   : > { %1668 = shalt.err (!%p1665_p4)
}
  0x2a   : > { %s1849_s10 = smov 128   ;;  %s1850_s13 = smov 8  }
  0x2b   : > { %1534 = dma.hbm_to_vmem [thread:$0]  (!%p1972_p11), %s2284_s1, 512, %s1965_s11, [#allocation8], %s1849_s10, %s1849_s10, %s1850_s13  }
  0x2c   : > { %s1669_s19 = scalar_lea.hbm %s2286_s3, 512 }
  0x2d   : > { %p1670_p1 = scmp.ne.s32.totalorder %s2286_s3, %s1669_s19  ;;  %p1676_p10 = scmp.lt.u32.totalorder %s1669_s19, %s2286_s3 }
  0x2f   : > { %p1672_p4 = pnand %p1670_p1, %p1643_p13 }
  0x31   : > { %p1673_p6 = pneg %p1672_p4 }
  0x33   : > { %p1678_p3 = pnand %p1676_p10, %p1673_p6 }
  0x35   : > { %1681 = shalt.err (!%p1678_p3)
}
  0x36   : > { %s1682_s11 = scalar_lea.vmem %s1976_s14, 512  ;;  %p1690_p12 = scmp.lt.s32.totalorder %s1976_s14, %s1976_s14 }
  0x37   : > { %p1683_p5 = scmp.ne.s32.totalorder %s1976_s14, %s1682_s11  ;;  %p1691_p0 = scmp.lt.s32.totalorder %s1682_s11, %s1682_s11 }
  0x39   : > { %p1685_p7 = pnand %p1683_p5, %p1643_p13  ;;  %p1692_p1 = por %p1691_p0, %p1690_p12 }
  0x3b   : > { %p1686_p9 = pneg %p1685_p7 }
  0x3d   : > { %p1693_p4 = pnand %p1692_p1, %p1686_p9 }
  0x3f   : > { %1696 = shalt.err (!%p1693_p4)
}
  0x40   : > { %1537 = dma.hbm_to_vmem [thread:$0]  (!%p1972_p11), %s2286_s3, 512, %s1976_s14, [#allocation8], %s1849_s10, %s1849_s10, %s1850_s13  }
  0x41   : > { %s39_s16 = sadd.s32 1, %s1841_s25  ;;  %s46_s17 = sadd.s32 1, %s1833_s23 }
  0x42   : > { %p41_p13 = scmp.ge.s32.totalorder %s39_s16, 2  ;;  %p53_p6 = scmp.ne.s32.totalorder %s1833_s23, %s1829_s22 }
  0x43   : > { %p54_p10 = scmp.eq.s32.totalorder %s1845_s26, 0  ;;  %p1551_p3 = scmp.lt.s32.totalorder %s1845_s26, 2 }
  0x44   : > { %s2316_s16 = smov (%p41_p13, %s39_s16), 0  ;;  %p2040_p7 = por %p1945_p2, %p53_p6 }
  0x45   : > { %p55_p5 = por %p54_p10, %p53_p6  ;;  %s43_s18 = ssub.s32 %s1841_s25, %s2316_s16 }
  0x46   : > { %s2302_s12 = scalar_select %p2040_p7, 1, 0 }
  0x47   : > { %s255_s19 = sand.u32 1, %s1833_s23   ;;  %p44_p9 = scmp.eq.s32.totalorder %s43_s18, 0 }
  0x48   : > { %s1382_s14 = sshll.u32 %s255_s19, 3  ;;  %s1383_s10 = sshll.u32 %s1841_s25, 7 }
  0x49   : > { %s2049_s13 = scalar_select %p44_p9, %s1833_s23, %s46_s17  }
  0x4a   : > { %s2054_s28 = scalar_lea.hbm %s2283_s0, %s1383_s10  ;;  %s259_s30 = scalar_lea.vmem [#allocation4], %s1382_s14 }
  0x4b   : > { %s266_s11 = sshll.u32 %s259_s30, 4  ;;  %p2058_p2 = pnand %p1551_p3, %p55_p5  ;;  %s2062_s11 = int_to_ptr.vmem [resolvable:$true] %s266_s11 }
  0x4c   : > { %s256_s15 = scalar_lea.sflag [#allocation5], %s255_s19  ;;  %s1697_s17 = scalar_lea.hbm %s2054_s28, 128 }
  0x4d   : > { %p1698_p11 = scmp.ne.s32.totalorder %s2054_s28, %s1697_s17  ;;  %p1699_p12 = pneg %p2058_p2 }
  0x4e   : > { %s1702_s10 = scalar_lea.hbm %s2283_s0, 256  ;;  %p1703_p4 = scmp.lt.u32.totalorder %s2054_s28, %s2283_s0 }
  0x4f   : > { %p1700_p0 = pnand %p1699_p12, %p1698_p11  ;;  %p1704_p13 = scmp.lt.u32.totalorder %s1702_s10, %s1697_s17 }
  0x50   : > { %p1706_p10 = scmp.lt.u32.totalorder %s1697_s17, %s2054_s28 }
  0x51   : > { %p1701_p1 = pneg %p1700_p0  ;;  %p1705_p6 = por %p1704_p13, %p1703_p4 }
  0x53   : > { %p1707_p3 = por %p1706_p10, %p1705_p6 }
  0x55   : > { %p1708_p5 = pnand %p1707_p3, %p1701_p1 }
  0x57   : > { %1711 = shalt.err (!%p1708_p5)
}
  0x58   : > { %s1712_s19 = scalar_lea.vmem %s2062_s11, 128  ;;  %s1851_s30 = smov [#allocation4]  }
  0x59   : > { %p1713_p9 = scmp.ne.s32.totalorder %s2062_s11, %s1712_s19  ;;  %s1717_s18 = sshll.u32 %s1851_s30, 4  ;;  %s1718_s18 = int_to_ptr.vmem [resolvable:$false] %s1717_s18 }
  0x5a   : > { %s1719_s14 = scalar_lea.vmem %s1718_s18, 256  ;;  %p1720_p7 = scmp.lt.s32.totalorder %s2062_s11, %s1718_s18 }
  0x5b   : > { %p1715_p11 = pnand %p1713_p9, %p1699_p12  ;;  %p1721_p4 = scmp.lt.s32.totalorder %s1719_s14, %s1712_s19 }
  0x5d   : > { %p1716_p0 = pneg %p1715_p11  ;;  %p1722_p13 = por %p1721_p4, %p1720_p7 }
  0x5f   : > { %p1723_p6 = pnand %p1722_p13, %p1716_p0 }
  0x61   : > { %1726 = shalt.err (!%p1723_p6)
}
  0x62   : > { %1541 = dma.hbm_to_vmem [thread:$0]  (!%p2058_p2), %s2054_s28, 128, %s2062_s11, %s256_s15  }
  0x63   : > { %275 = sbr.rel (%p1961_p8) target bundleno = 2128 (0x850), region = 40  ;;  %s2092_s17 = sand.u32 (!%p1961_p8), 1, %s1829_s22  }
  0x64   : > { %s1385_s10 = sshll.u32 (!%p1961_p8), %s2092_s17, 3  ;;  %s278_s20 = scalar_lea.sflag (!%p1961_p8), [#allocation5], %s2092_s17 }
  0x65   : > { %s281_s27 = scalar_lea.vmem (!%p1961_p8), [#allocation4], %s1385_s10  ;;  %p2304_p7 = scmp.ne.s32.totalorder (!%p1961_p8), %s2297_s7, 0 }
  0x6a   : > { %1808 = dma.done.wait (%p2304_p7), %s278_s20, 128  }
  0x6b   : > { %1810 = vsyncadd (%p2304_p7), %s278_s20, 4294967168  ;;  %p2305_p2 = scmp.ne.s32.totalorder %s2295_s29, 0 }
  0x6d   : > { %1812 = dma.done.wait (%p2305_p2), [#allocation8], 1024  }
  0x6e   : > { %1814 = vsyncadd (%p2305_p2), [#allocation8], 4294966272  ;;  %v1852_v0 = vmov 0.0|0.0   ;;  %vm1853_vm0 = vmmov 0   ;;  %v1854_v1 = vmov 0.0   ;;  %v328_v2 = vld [vmem:[#allocation7] sm:$0xff] }
  0x6f   : > { %1505 = vmatprep.subr.bf16.mxu0 %v1852_v0  ;;  %1451 = vmatprep.mubr.msk.f32.mxu0 %vm1853_vm0, %v1854_v1  ;;  %v329_v3 = vld [vmem:[#allocation7 + $0x8] sm:$0xff]  ;;  %v330_v4 = vld [vmem:[#allocation7 + $0x10] sm:$0xff]  ;;  %v331_v6 = vld [vmem:[#allocation7 + $0x18] sm:$0xff]  ;;  %vm339_vm1 = vcmask 261120   ;;  %vm413_vm2 = vcmask 785408   ;;  %s1855_s9 = smov 64  }
  0x70   : > { %1454 = vmatprep.subr.mxu1 %v1854_v1  ;;  %1456 = vmatprep.mubr.msk.f32.mxu1 %vm1853_vm0, %v1854_v1  ;;  %v1506_v5 = vpack.c.bf16 %v329_v3, %v328_v2  ;;  %v1509_v7 = vpack.c.bf16 %v331_v6, %v330_v4  ;;  %v327_v8 = vld [vmem:[%s281_s27] sm:$0xff]  ;;  %v1390_v9 = vld [vmem:[%s2285_s2] ss:$0 sm:$0xff]  ;;  %s1856_s28 = smov 96   ;;  %s1857_s11 = smov 88   ;;  %vm422_vm3 = vcmask 64512  }
  0x71   : > { %s1858_s8 = smov 120   ;;  %s1859_s15 = smov 80   ;;  %vm762_vm4 = vcmask 130112   ;;  %vm939_vm5 = vcmask 195712   ;;  %vm1116_vm6 = vcmask 261312  }
  0x72   : > { %1507 = vmatpush3.bf16.msra.mxu0 %v1506_v5  ;;  %s1860_s19 = smov 72   ;;  %s1861_s30 = smov 112  }
  0x73   : > { %1508 = vmatprep.subr.bf16.mxu0 %v1852_v0  ;;  %s1862_s18 = smov 104   ;;  %s1389_s14 = sshll.u32 %s2092_s17, 5 }
  0x74   : > { %s2150_s20 = scalar_lea.vmem [#allocation11], %s1389_s14  ;;  %s1863_s27 = smov 56  }
  0x75   : > { %s1864_s29 = smov 48   ;;  %s1865_s7 = smov 40  }
  0x76   : > { %1510 = vmatpush3.bf16.msra.mxu0 %v1509_v7  ;;  %s1211_s14 = scalar_lea.sflag [#allocation12], %s2092_s17  ;;  %p2306_p12 = scmp.ne.s32.totalorder %s2302_s12, 0 }
  0x77   : > { %1474 = vmatprep.subr.mxu0 %v1854_v1 }
  0x79   : > { %1452 = vmatmul.mubr.msk.f32.vlgmr.msra.gmra.mrb[0].mxu0 %vm339_vm1, %v327_v8 }
  0x7a   : > { %1476 = vmatprep.mubr.msk.f32.mxu0 %vm1853_vm0, %v1854_v1 }
 0x14c   : > { %v409_v10 = vpop.f32.mrb[0].mxu0 }
 0x14d   : > { %v410_v11 = vadd.f32 %v1390_v9, %v409_v10  ;;  %v1453_v12 = vpop.f32.mrb[1].mxu0  ;;  %v1119_v9 = vld [vmem:[#allocation9] sm:$0xff]  ;;  %v1120_v10 = vld [vmem:[#allocation9 + $0x8] sm:$0xff] }
 0x14e   : > { %v1121_v12 = vld [vmem:[#allocation9 + $0x10] sm:$0xff] }
 0x14f   : > { %414 = vst.msk [vmem:[#allocation2] sm:$0xff] %vm413_vm2, %v410_v11  ;;  %v1512_v11 = vpack.c.bf16 %v1120_v10, %v1119_v9 }
 0x156   : > { %v2120_v13 = vld [vmem:[#allocation2] sm:$0xff] }
 0x157   : > { %510 = vrot.lane.b32.xlu1 %v2120_v13, %s1855_s9  ;;  %420 = vrot.lane.b32.xlu0 %v2120_v13, %s1856_s28  ;;  %s1866_s9 = smov 8   ;;  %s1867_s28 = smov 16  }
 0x15b   : > { %593 = vrot.lane.b32.xlu1 %v2120_v13, %s1857_s11  ;;  %s1868_s11 = smov 24  }
 0x15f   : > { %590 = vrot.lane.b32.xlu1 %v2120_v13, %s1858_s8  ;;  %s1416_s8 = sshll.u32 %s1837_s24, 9 }
 0x163   : > { %770 = vrot.lane.b32.xlu1 %v2120_v13, %s1859_s15  ;;  %s1239_s15 = sshll.u32 %s2150_s20, 4  ;;  %s2197_s15 = int_to_ptr.vmem [resolvable:$true] %s1239_s15 }
 0x1c9   : > { %v511_v14 = vpop.permute.xlu1 %510  ;;  %v421_v15 = vpop.permute.xlu0 %420 }
 0x1ca   : > { %1455 = vmatpush3.xpose.msk.msra.mxu1 %vm422_vm3, %v421_v15 }
 0x1cb   : > { %1459 = vmatprep.subr.mxu1 %v1854_v1 }
 0x1cd   : > { %v594_v16 = vpop.permute.xlu1 %593  ;;  %1457 = vmatmul.mubr.msk.f32.vlgmr.msra.gmra.mrb[0].mxu1 %vm422_vm3, %v2120_v13 }
 0x1ce   : > { %1460 = vmatpush3.msra.mxu1 %v511_v14  ;;  %1461 = vmatprep.mubr.msk.f32.mxu1 %vm1853_vm0, %v1854_v1 }
 0x1cf   : > { %1464 = vmatprep.subr.mxu1 %v1854_v1 }
 0x1d1   : > { %v591_v17 = vpop.permute.xlu1 %590 }
 0x1d5   : > { %v771_v18 = vpop.permute.xlu1 %770 }
 0x1d6   : > { %1475 = vmatpush3.xpose.msk.msra.mxu0 %vm422_vm3, %v771_v18 }
 0x1d7   : > { %1484 = vmatprep.subr.mxu0 %v1854_v1 }
 0x2a0   : > { %v494_v19 = vpop.f32.mrb[0].mxu1 }
 0x2a1   : > { %v1458_v20 = vpop.f32.mrb[1].mxu1  ;;  %v498_v21 = vsel %vm422_vm3, %v494_v19, -inf }
 0x2a2   : > { %499 = vmax.xlane.f32.xlu0 %v498_v21 }
 0x2b8   : > { %947 = vrot.lane.b32.xlu0 %v2120_v13, %s1860_s19 }
 0x32f   : > { %v500_v22 = vpop.xlane.xlu0 %499 }
 0x330   : > { %v501_v23 = vsub.f32 %v494_v19, %v500_v22 }
 0x332   : > { %v502_v24 = vmul.f32 1.442695, %v501_v23 }
 0x333   : > { %v948_v29 = vpop.permute.xlu0 %947 }
 0x334   : > { %1625 = vpow2.f32 %v502_v24 }
 0x33e   : > { %v1626_v25 = vpop.eup %1625 }
 0x33f   : > { %v504_v26 = vsel %vm422_vm3, %v1626_v25, 0.0 }
 0x340   : > { %505 = vadd.xlane.f32.xlu1 %v504_v26 }
 0x351   : > { %767 = vrot.lane.b32.xlu1 %v2120_v13, %s1861_s30 }
 0x355   : > { %944 = vrot.lane.b32.xlu1 %v2120_v13, %s1862_s18  ;;  %s2195_s18 = scalar_lea.hbm %s2289_s6, %s1416_s8 }
 0x3cd   : > { %v506_v27 = vpop.xlane.xlu1 %505 }
 0x3ce   : > { %1627 = vrcp.f32 %v506_v27 }
 0x3d1   : > { %v768_v28 = vpop.permute.xlu1 %767 }
 0x3d2   : > { %1477 = vmatmul.mubr.msk.f32.vlgmr.msra.gmra.mrb[2].mxu0 %vm422_vm3, %v768_v28 }
 0x3d3   : > { %1485 = vmatpush3.xpose.msk.msra.mxu0 %vm422_vm3, %v948_v29  ;;  %1486 = vmatprep.mubr.msk.f32.mxu0 %vm1853_vm0, %v1854_v1 }
 0x3d4   : > { %1511 = vmatprep.subr.bf16.mxu0 %v1852_v0 }
 0x3d5   : > { %v945_v30 = vpop.permute.xlu1 %944 }
 0x3d6   : > { %1487 = vmatmul.mubr.msk.f32.vlgmr.msra.gmra.mrb[4].mxu0 %vm422_vm3, %v945_v30 }
 0x3d7   : > { %1502 = vmatprep.mubr.msk.f32.mxu0 %vm1853_vm0, %v1854_v1  ;;  %1513 = vmatpush3.bf16.msra.mxu0 %v1512_v11 }
 0x3d8   : > { %v1628_v31 = vpop.eup %1627  ;;  %1514 = vmatprep.subr.bf16.mxu0 %v1852_v0 }
 0x3d9   : > { %v508_v32 = vmul.f32 %v1628_v31, %v1626_v25 }
 0x3db   : > { %509 = vst.msk [vmem:[%s2150_s20] sm:$0xff] %vm422_vm3, %v508_v32  ;;  %1462 = vmatmul.mubr.msk.f32.vlgmr.msra.gmra.mrb[2].mxu1 %vm422_vm3, %v508_v32 }
 0x3dc   : > { %1465 = vmatpush3.xpose.msk.msra.mxu1 %vm422_vm3, %v594_v16  ;;  %1466 = vmatprep.mubr.msk.f32.mxu1 %vm1853_vm0, %v1854_v1 }
 0x3dd   : > { %1469 = vmatprep.subr.mxu1 %v1854_v1 }
 0x3df   : > { %1467 = vmatmul.mubr.msk.f32.vlgmr.msra.gmra.mrb[4].mxu1 %vm422_vm3, %v591_v17 }
 0x3e0   : > { %1471 = vmatprep.mubr.msk.f32.mxu1 %vm1853_vm0, %v1854_v1 }
 0x4a5   : > { %v842_v33 = vpop.f32.mrb[2].mxu0 }
 0x4a6   : > { %v1478_v34 = vpop.f32.mrb[3].mxu0  ;;  %v846_v35 = vsel %vm422_vm3, %v842_v33, -inf }
 0x4a7   : > { %847 = vmax.xlane.f32.xlu0 %v846_v35 }
 0x4a9   : > { %v1019_v36 = vpop.f32.mrb[4].mxu0 }
 0x4aa   : > { %v1488_v37 = vpop.f32.mrb[5].mxu0  ;;  %v1023_v43 = vsel %vm422_vm3, %v1019_v36, -inf }
 0x4ae   : > { %v582_v38 = vpop.f32.mrb[2].mxu1 }
 0x4af   : > { %586 = vst.msk [vmem:[#allocation3] sm:$0xff] %vm422_vm3, %v582_v38  ;;  %v1463_v39 = vpop.f32.mrb[3].mxu1 }
 0x4b2   : > { %v665_v40 = vpop.f32.mrb[4].mxu1 }
 0x4b3   : > { %v1468_v41 = vpop.f32.mrb[5].mxu1  ;;  %v669_v42 = vsel %vm422_vm3, %v665_v40, -inf }
 0x4b4   : > { %670 = vmax.xlane.f32.xlu1 %v669_v42 }
 0x4b8   : > { %1024 = vmax.xlane.f32.xlu1 %v1023_v43 }
 0x534   : > { %v848_v44 = vpop.xlane.xlu0 %847 }
 0x535   : > { %v849_v45 = vsub.f32 %v842_v33, %v848_v44 }
 0x537   : > { %v850_v46 = vmul.f32 1.442695, %v849_v45 }
 0x539   : > { %1629 = vpow2.f32 %v850_v46 }
 0x541   : > { %v671_v47 = vpop.xlane.xlu1 %670 }
 0x542   : > { %v672_v55 = vsub.f32 %v665_v40, %v671_v47 }
 0x543   : > { %v1630_v48 = vpop.eup %1629 }
 0x544   : > { %v852_v49 = vsel %vm422_vm3, %v1630_v48, 0.0  ;;  %v673_v56 = vmul.f32 1.442695, %v672_v55 }
 0x545   : > { %853 = vadd.xlane.f32.xlu1 %v852_v49  ;;  %v1025_v50 = vpop.xlane.xlu1 %1024 }
 0x546   : > { %v1026_v51 = vsub.f32 %v1019_v36, %v1025_v50 }
 0x548   : > { %v1027_v52 = vmul.f32 1.442695, %v1026_v51 }
 0x54a   : > { %1631 = vpow2.f32 %v1027_v52 }
 0x54b   : > { %1633 = vpow2.f32 %v673_v56 }
 0x554   : > { %v1632_v53 = vpop.eup %1631 }
 0x555   : > { %v1029_v54 = vsel %vm422_vm3, %v1632_v53, 0.0  ;;  %v1634_v57 = vpop.eup %1633 }
 0x556   : > { %682 = vrot.lane.b32.xlu1 %v2120_v13, %s1863_s27  ;;  %1030 = vadd.xlane.f32.xlu0 %v1029_v54  ;;  %v675_v58 = vsel %vm422_vm3, %v1634_v57, 0.0  ;;  %s1727_s27 = scalar_lea.vmem %s2197_s15, 512 }
 0x557   : > { %p1728_p8 = scmp.ne.s32.totalorder %s2197_s15, %s1727_s27 }
 0x559   : > { %p1729_p1 = pnand %p1728_p8, %p2306_p12 }
 0x55b   : > { %p1730_p10 = pneg %p1729_p1 }
 0x56c   : > { %859 = vrot.lane.b32.xlu0 %v2120_v13, %s1864_s29  ;;  %s1869_s29 = smov [#allocation11]  }
 0x57a   : > { %676 = vadd.xlane.f32.xlu1 %v675_v58 }
 0x58b   : > { %1036 = vrot.lane.b32.xlu1 %v2120_v13, %s1865_s7  ;;  %v1122_v13 = vld [vmem:[#allocation9 + $0x18] sm:$0xff]  ;;  %s1731_s7 = sshll.u32 %s1869_s29, 4  ;;  %s1732_s7 = int_to_ptr.vmem [resolvable:$false] %s1731_s7 }
 0x58c   : > { %v1515_v14 = vpack.c.bf16 %v1122_v13, %v1121_v12  ;;  %p1734_p3 = scmp.lt.s32.totalorder %s2197_s15, %s1732_s7 }
 0x58e   : > { %1516 = vmatpush3.bf16.msra.mxu0 %v1515_v14 }
 0x5d2   : > { %v854_v59 = vpop.xlane.xlu1 %853 }
 0x5d3   : > { %1635 = vrcp.f32 %v854_v59 }
 0x5d6   : > { %v683_v60 = vpop.permute.xlu1 %682 }
 0x5d7   : > { %1470 = vmatpush3.msra.mxu1 %v683_v60 }
 0x5d8   : > { %1479 = vmatprep.subr.mxu1 %v1854_v1 }
 0x5dd   : > { %v1636_v61 = vpop.eup %1635 }
 0x5de   : > { %v856_v62 = vmul.f32 %v1636_v61, %v1630_v48 }
 0x5e0   : > { %1401 = vst.msk [vmem:[%s2150_s20 + $0x10] sm:$0xff] %vm422_vm3, %v856_v62 }
 0x5e3   : > { %v1031_v63 = vpop.xlane.xlu0 %1030 }
 0x5e4   : > { %1637 = vrcp.f32 %v1031_v63 }
 0x5e7   : > { %v860_v7 = vpop.permute.xlu0 %859 }
 0x5ee   : > { %v1638_v2 = vpop.eup %1637 }
 0x5ef   : > { %v1033_v3 = vmul.f32 %v1638_v2, %v1632_v53 }
 0x5f1   : > { %1405 = vst.msk [vmem:[%s2150_s20 + $0x18] sm:$0xff] %vm422_vm3, %v1033_v3 }
 0x607   : > { %v677_v4 = vpop.xlane.xlu1 %676 }
 0x608   : > { %1639 = vrcp.f32 %v677_v4 }
 0x60b   : > { %v1037_v8 = vpop.permute.xlu1 %1036 }
 0x612   : > { %v1640_v5 = vpop.eup %1639 }
 0x613   : > { %v679_v6 = vmul.f32 %v1640_v5, %v1634_v57 }
 0x615   : > { %1397 = vst.msk [vmem:[%s2150_s20 + $0x8] sm:$0xff] %vm422_vm3, %v679_v6  ;;  %1472 = vmatmul.mubr.msk.f32.vlgmr.msra.gmra.mrb[6].mxu1 %vm422_vm3, %v679_v6  ;;  %s1733_s20 = scalar_lea.vmem %s1732_s7, 1024 }
 0x616   : > { %1480 = vmatpush3.msra.mxu1 %v860_v7  ;;  %1481 = vmatprep.mubr.msk.f32.mxu1 %vm1853_vm0, %v1854_v1  ;;  %p1735_p5 = scmp.lt.s32.totalorder %s1733_s20, %s1727_s27 }
 0x617   : > { %1489 = vmatprep.subr.mxu1 %v1854_v1 }
 0x618   : > { %p1736_p9 = por %p1735_p5, %p1734_p3 }
 0x619   : > { %1482 = vmatmul.mubr.msk.f32.vlgmr.msra.gmra.mrb[8].mxu1 %vm422_vm3, %v856_v62 }
 0x61a   : > { %1490 = vmatpush3.msra.mxu1 %v1037_v8  ;;  %1491 = vmatprep.mubr.msk.f32.mxu1 %vm1853_vm0, %v1854_v1  ;;  %p1737_p11 = pnand %p1736_p9, %p1730_p10 }
 0x61d   : > { %1492 = vmatmul.mubr.msk.f32.vlgmr.msra.gmra.mrb[10].mxu1 %vm422_vm3, %v1033_v3 }
 0x6e8   : > { %v754_v15 = vpop.f32.mrb[6].mxu1 }
 0x6e9   : > { %759 = vrot.lane.b32.xlu1 %v754_v15, %s1866_s9  ;;  %v1473_v16 = vpop.f32.mrb[7].mxu1 }
 0x6ec   : > { %v931_v17 = vpop.f32.mrb[8].mxu1 }
 0x6ed   : > { %936 = vrot.lane.b32.xlu0 %v931_v17, %s1867_s28  ;;  %v1483_v1 = vpop.f32.mrb[9].mxu1 }
 0x6f0   : > { %v1108_v18 = vpop.f32.mrb[10].mxu1 }
 0x6f1   : > { %1113 = vrot.lane.b32.xlu1 %v1108_v18, %s1868_s11  ;;  %v1493_v19 = vpop.f32.mrb[11].mxu1 }
 0x75b   : > { %v760_v20 = vpop.permute.xlu1 %759 }
 0x75c   : > { %763 = vst.msk [vmem:[#allocation3] sm:$0xff] %vm762_vm4, %v760_v20 }
 0x75f   : > { %v937_v0 = vpop.permute.xlu0 %936 }
 0x760   : > { %940 = vst.msk [vmem:[#allocation3] sm:$0xff] %vm939_vm5, %v937_v0 }
 0x763   : > { %v1114_v21 = vpop.permute.xlu1 %1113 }
 0x764   : > { %1117 = vst.msk [vmem:[#allocation3] sm:$0xff] %vm1116_vm6, %v1114_v21 }
 0x76b   : > { %v1118_v22 = vld [vmem:[#allocation3] sm:$0xff] }
 0x76c   : > { %1503 = vmatmul.mubr.msk.f32.vlgmr.msra.gmra.mrb[6].mxu0 %vm339_vm1, %v1118_v22 }
 0x76d   : > { %1740 = shalt.err (!%p1737_p11)
}
 0x76e   : > { %s1741_s28 = scalar_lea.hbm %s2195_s18, 512  ;;  %s1745_s19 = scalar_lea.hbm %s2289_s6, 1024 }
 0x76f   : > { %p1742_p0 = scmp.ne.s32.totalorder %s2195_s18, %s1741_s28  ;;  %p1746_p6 = scmp.lt.u32.totalorder %s2195_s18, %s2289_s6 }
 0x770   : > { %p1747_p7 = scmp.lt.u32.totalorder %s1745_s19, %s1741_s28  ;;  %p1749_p8 = scmp.lt.u32.totalorder %s1741_s28, %s2195_s18 }
 0x771   : > { %p1743_p4 = pnand %p1742_p0, %p2306_p12 }
 0x772   : > { %p1748_p2 = por %p1747_p7, %p1746_p6 }
 0x773   : > { %p1744_p13 = pneg %p1743_p4 }
 0x774   : > { %p1750_p1 = por %p1749_p8, %p1748_p2 }
 0x776   : > { %p1751_p10 = pnand %p1750_p1, %p1744_p13 }
 0x778   : > { %1754 = shalt.err (!%p1751_p10)
}
 0x779   : > { %s1870_s27 = smov 128   ;;  %v1407_v23 = vld [vmem:[%s2287_s4] ss:$0 sm:$0xff]  ;;  %s1411_s28 = sshll.u32 %s1837_s24, 7 }
 0x77a   : > { %1528 = dma.vmem_to_hbm [thread:$0]  (%p2306_p12), %s2197_s15, 512, %s2195_s18, %s1211_s14, %s1870_s27, %s1870_s27, %s1866_s9  }
 0x77b   : > { %s315_s11 = scalar_lea.vmem [#allocation10], %s1385_s10  ;;  %s2233_s29 = scalar_lea.hbm %s2288_s5, %s1411_s28 }
 0x77c   : > { %s1225_s8 = sshll.u32 %s315_s11, 4  ;;  %s1206_s9 = scalar_lea.sflag [#allocation6], %s2092_s17  ;;  %s2235_s8 = int_to_ptr.vmem [resolvable:$true] %s1225_s8 }
 0x77d   : > { %s1755_s24 = scalar_lea.vmem %s2235_s8, 128  ;;  %s1871_s10 = smov [#allocation10]  }
 0x77e   : > { %p1756_p3 = scmp.ne.s32.totalorder %s2235_s8, %s1755_s24  ;;  %s1759_s15 = sshll.u32 %s1871_s10, 4  ;;  %s1760_s15 = int_to_ptr.vmem [resolvable:$false] %s1759_s15 }
 0x77f   : > { %s1761_s18 = scalar_lea.vmem %s1760_s15, 256  ;;  %p1762_p11 = scmp.lt.s32.totalorder %s2235_s8, %s1760_s15 }
 0x780   : > { %p1757_p5 = pnand %p1756_p3, %p2306_p12  ;;  %p1763_p0 = scmp.lt.s32.totalorder %s1761_s18, %s1755_s24 }
 0x782   : > { %p1758_p9 = pneg %p1757_p5  ;;  %p1764_p4 = por %p1763_p0, %p1762_p11 }
 0x784   : > { %p1765_p13 = pnand %p1764_p4, %p1758_p9 }
 0x83f   : > { %v1200_v24 = vpop.f32.mrb[6].mxu0 }
 0x840   : > { %v1201_v25 = vadd.f32 %v1407_v23, %v1200_v24  ;;  %v1504_v26 = vpop.f32.mrb[7].mxu0 }
 0x842   : > { %1204 = vst.msk [vmem:[%s315_s11] sm:$0xff] %vm339_vm1, %v1201_v25 }
 0x843   : > { %1768 = shalt.err (!%p1765_p13)
}
 0x844   : > { %s1769_s17 = scalar_lea.hbm %s2233_s29, 128  ;;  %s1773_s7 = scalar_lea.hbm %s2288_s5, 256 }
 0x845   : > { %p1770_p6 = scmp.ne.s32.totalorder %s2233_s29, %s1769_s17  ;;  %p1774_p8 = scmp.lt.u32.totalorder %s2233_s29, %s2288_s5 }
 0x846   : > { %p1775_p1 = scmp.lt.u32.totalorder %s1773_s7, %s1769_s17  ;;  %p1777_p3 = scmp.lt.u32.totalorder %s1769_s17, %s2233_s29 }
 0x847   : > { %p1771_p7 = pnand %p1770_p6, %p2306_p12 }
 0x848   : > { %p1776_p10 = por %p1775_p1, %p1774_p8 }
 0x849   : > { %p1772_p2 = pneg %p1771_p7 }
 0x84a   : > { %p1778_p5 = por %p1777_p3, %p1776_p10 }
 0x84c   : > { %p1779_p9 = pnand %p1778_p5, %p1772_p2 }
 0x84e   : > { %1782 = shalt.err (!%p1779_p9)
}
 0x84f   : > { %1527 = dma.vmem_to_hbm [thread:$0]  (%p2306_p12), %s2235_s8, 128, %s2233_s29, %s1206_s9  }
 0x850 PF: > { %s2307_s11 = sld [smem:[#allocation17_spill]]  ;;  %s1254_s19 = sand.u32 1, %s1825_s21  }
 0x851   : > { %p2309_p0 = scmp.ge.s32.totalorder %s1845_s26, 2  ;;  %s1255_s30 = scalar_lea.sflag [#allocation6], %s1254_s19 }
 0x856   : > { %p2308_p11 = scmp.ne.s32.totalorder %s2307_s11, 0 }
 0x858   : > { %p1543_p4 = pnand %p2309_p0, %p2308_p11 }
 0x85a   : > { %1816 = dma.done.wait (!%p1543_p4), %s1255_s30, 128  }
 0x85b   : > { %1818 = vsyncadd (!%p1543_p4), %s1255_s30, 4294967168  ;;  %s1264_s24 = scalar_lea.sflag [#allocation12], %s1254_s19 }
 0x85c   : > { %1820 = dma.done.wait (!%p1543_p4), %s1264_s24, 512  }
 0x85d   : > { %1822 = vsyncadd (!%p1543_p4), %s1264_s24, 4294966784  ;;  %s27_s26 = sadd.s32 1, %s1845_s26   ;;  %s2310_s21 = smov %s1829_s22 }
 0x85e   : > { %p24_p13 = scmp.ge.s32.totalorder %s27_s26, 4   ;;  %s2311_s22 = smov %s1833_s23 }
 0x85f   : > { %s2312_s23 = smov %s2049_s13  ;;  %s2313_s24 = smov %s1841_s25 }
 0x860   : > { %s2314_s25 = smov %s2316_s16  ;;  %26 = sbr.rel (!%p24_p13) target bundleno = 9 (0x9), region = 118 }
 0x867   :  { %1269 = vsyncpa [#allocation5], 1 }
 0x868   :  { %1271 = vsyncpa [#allocation5 + $0x1], 1 }
 0x869   :  { %1272 = vsyncpa [#allocation8], 1 }
 0x86a   :  { %1273 = vsyncpa [#allocation6], 1 }
 0x86b   :  { %1275 = vsyncpa [#allocation6 + $0x1], 1 }
 0x86c   :  { %1276 = vsyncpa [#allocation12], 1 }
 0x86d   :  { %1278 = vsyncpa [#allocation12 + $0x1], 1 }

// kernel: tpu_custom_call.1
= control target key start
LH: loop header
LB: loop body
LE: loop exit
PB: predicated region body
PF: predicated region fallthrough
CT: control target
= control target key end

     0   :  { %12 = vsyncpa [#allocation5], 0  ;;  %s2283_s0 = inlined_call_operand.hbm [shape: f32[2,8,32], index: 0, kind: input, shape index: {}]   ;;  %s2284_s1 = inlined_call_operand.hbm [shape: f32[32,96], index: 1, kind: input, shape index: {}]   ;;  %s2285_s2 = inlined_call_operand.vmem [shape: f32[1,96], index: 2, kind: input, shape index: {}]   ;;  %s2286_s3 = inlined_call_operand.hbm [shape: f32[32,32], index: 3, kind: input, shape index: {}]   ;;  %s2287_s4 = inlined_call_operand.vmem [shape: f32[1,32], index: 4, kind: input, shape index: {}]   ;;  %s2288_s5 = inlined_call_operand.hbm [shape: f32[2,8,32], index: 5, kind: output, shape index: {0}]   ;;  %s2289_s6 = inlined_call_operand.hbm [shape: f32[2,4,8,128], index: 6, kind: output, shape index: {1}]  }
   0x1   :  { %14 = vsyncpa [#allocation5 + $0x1], 0 }
   0x2   :  { %15 = vsyncpa [#allocation8], 0 }
   0x3   :  { %16 = vsyncpa [#allocation6], 0 }
   0x4   :  { %18 = vsyncpa [#allocation6 + $0x1], 0 }
   0x5   :  { %19 = vsyncpa [#allocation12], 0 }
   0x6   :  { %21 = vsyncpa [#allocation12 + $0x1], 0  ;;  %s1907_s21 = smov 0   ;;  %s1909_s22 = smov 0  }
   0x7   :  { %s1911_s23 = smov 0   ;;  %s1913_s24 = smov 0  }
   0x8   :  { %s1915_s25 = smov 0   ;;  %s1917_s26 = smov 0  }
   0x9 LB: > { %s1376_s27 = sadd.s32 4294967295, %s1845_s26   ;;  %s1377_s28 = sadd.s32 4294967294, %s1845_s26   ;;  %s1845_s26 = sphi %s1917_s26, %s27_s26   ;;  %s1841_s25 = sphi %s1915_s25, %s2314_s25   ;;  %s1837_s24 = sphi %s1913_s24, %s2313_s24   ;;  %s1833_s23 = sphi %s1911_s23, %s2312_s23   ;;  %s1829_s22 = sphi %s1909_s22, %s2311_s22   ;;  %s1825_s21 = sphi %s1907_s21, %s2310_s21  }
   0xa   : > { %p59_p0 = scmp.ne.s32.totalorder %s1829_s22, %s1825_s21  ;;  %p1941_p1 = scmp.eq.s32.totalorder %s1376_s27, 0 }
   0xb   : > { %p1945_p2 = scmp.eq.s32.totalorder %s1376_s27, 1  ;;  %p175_p3 = scmp.eq.s32.totalorder %s1377_s28, 1 }
   0xc   : > { %s2295_s29 = scalar_select %p1941_p1, 1, 0 }
   0xd   : > { %p1951_p4 = por %p1941_p1, %p59_p0  ;;  %p1378_p5 = scmp.ge.s32.totalorder %s1845_s26, 1 }
   0xe   : > { %p1956_p6 = por %p175_p3, %p59_p0  ;;  %p210_p7 = scmp.lt.s32.totalorder %s1845_s26, 3 }
   0xf   : > { %s2297_s7 = scalar_select %p1951_p4, 1, 0 }
  0x10   : > { %s2298_s8 = scalar_select %p1956_p6, 1, 0 }
  0x11   : > { %p1961_p8 = pnand %p1378_p5, %p210_p7  ;;  %s1847_s10 = smov [#allocation7]  }
  0x12   : > { %2299 = sst [smem:[#allocation17_spill]] %s2298_s8  ;;  %s222_s11 = sshll.u32 %s1847_s10, 4  ;;  %s1965_s11 = int_to_ptr.vmem [resolvable:$true] %s222_s11 }
  0x13   : > { %p1531_p9 = pneg %p1961_p8  ;;  %s1848_s13 = smov [#allocation9]  }
  0x14   : > { %s238_s14 = sshll.u32 %s1848_s13, 4  ;;  %s1641_s17 = scalar_lea.hbm %s2284_s1, 512  ;;  %s1976_s14 = int_to_ptr.vmem [resolvable:$true] %s238_s14 }
  0x15   : > { %p1972_p11 = pnand %p1531_p9, %p1941_p1  ;;  %p1642_p12 = scmp.ne.s32.totalorder %s2284_s1, %s1641_s17 }
  0x16   : > { %p1648_p5 = scmp.lt.u32.totalorder %s1641_s17, %s2284_s1 }
  0x17   : > { %p1643_p13 = pneg %p1972_p11 }
  0x19   : > { %p1644_p0 = pnand %p1643_p13, %p1642_p12 }
  0x1b   : > { %p1645_p3 = pneg %p1644_p0 }
  0x1d   : > { %p1650_p7 = pnand %p1648_p5, %p1645_p3 }
  0x1f   : > { %1653 = shalt.err (!%p1650_p7)
}
  0x20   : > { %s1654_s28 = scalar_lea.vmem %s1965_s11, 512  ;;  %p1662_p1 = scmp.lt.s32.totalorder %s1965_s11, %s1965_s11 }
  0x21   : > { %p1655_p9 = scmp.ne.s32.totalorder %s1965_s11, %s1654_s28  ;;  %p1663_p12 = scmp.lt.s32.totalorder %s1654_s28, %s1654_s28 }
  0x23   : > { %p1657_p10 = pnand %p1655_p9, %p1643_p13  ;;  %p1664_p0 = por %p1663_p12, %p1662_p1 }
  0x25   : > { %p1658_p6 = pneg %p1657_p10 }
  0x27   : > { %p1665_p4 = pnand %p1664_p0, %p1658_p6 }
  0x29   : > { %1668 = shalt.err (!%p1665_p4)
}
  0x2a   : > { %s1849_s10 = smov 128   ;;  %s1850_s13 = smov 8  }
  0x2b   : > { %1534 = dma.hbm_to_vmem [thread:$0]  (!%p1972_p11), %s2284_s1, 512, %s1965_s11, [#allocation8], %s1849_s10, %s1849_s10, %s1850_s13  }
  0x2c   : > { %s1669_s19 = scalar_lea.hbm %s2286_s3, 512 }
  0x2d   : > { %p1670_p1 = scmp.ne.s32.totalorder %s2286_s3, %s1669_s19  ;;  %p1676_p10 = scmp.lt.u32.totalorder %s1669_s19, %s2286_s3 }
  0x2f   : > { %p1672_p4 = pnand %p1670_p1, %p1643_p13 }
  0x31   : > { %p1673_p6 = pneg %p1672_p4 }
  0x33   : > { %p1678_p3 = pnand %p1676_p10, %p1673_p6 }
  0x35   : > { %1681 = shalt.err (!%p1678_p3)
}
  0x36   : > { %s1682_s11 = scalar_lea.vmem %s1976_s14, 512  ;;  %p1690_p12 = scmp.lt.s32.totalorder %s1976_s14, %s1976_s14 }
  0x37   : > { %p1683_p5 = scmp.ne.s32.totalorder %s1976_s14, %s1682_s11  ;;  %p1691_p0 = scmp.lt.s32.totalorder %s1682_s11, %s1682_s11 }
  0x39   : > { %p1685_p7 = pnand %p1683_p5, %p1643_p13  ;;  %p1692_p1 = por %p1691_p0, %p1690_p12 }
  0x3b   : > { %p1686_p9 = pneg %p1685_p7 }
  0x3d   : > { %p1693_p4 = pnand %p1692_p1, %p1686_p9 }
  0x3f   : > { %1696 = shalt.err (!%p1693_p4)
}
  0x40   : > { %1537 = dma.hbm_to_vmem [thread:$0]  (!%p1972_p11), %s2286_s3, 512, %s1976_s14, [#allocation8], %s1849_s10, %s1849_s10, %s1850_s13  }
  0x41   : > { %s39_s16 = sadd.s32 1, %s1841_s25  ;;  %s46_s17 = sadd.s32 1, %s1833_s23 }
  0x42   : > { %p41_p13 = scmp.ge.s32.totalorder %s39_s16, 2  ;;  %p53_p6 = scmp.ne.s32.totalorder %s1833_s23, %s1829_s22 }
  0x43   : > { %p54_p10 = scmp.eq.s32.totalorder %s1845_s26, 0  ;;  %p1551_p3 = scmp.lt.s32.totalorder %s1845_s26, 2 }
  0x44   : > { %s2316_s16 = smov (%p41_p13, %s39_s16), 0  ;;  %p2040_p7 = por %p1945_p2, %p53_p6 }
  0x45   : > { %p55_p5 = por %p54_p10, %p53_p6  ;;  %s43_s18 = ssub.s32 %s1841_s25, %s2316_s16 }
  0x46   : > { %s2302_s12 = scalar_select %p2040_p7, 1, 0 }
  0x47   : > { %s255_s19 = sand.u32 1, %s1833_s23   ;;  %p44_p9 = scmp.eq.s32.totalorder %s43_s18, 0 }
  0x48   : > { %s1382_s14 = sshll.u32 %s255_s19, 3  ;;  %s1383_s10 = sshll.u32 %s1841_s25, 7 }
  0x49   : > { %s2049_s13 = scalar_select %p44_p9, %s1833_s23, %s46_s17  }
  0x4a   : > { %s2054_s28 = scalar_lea.hbm %s2283_s0, %s1383_s10  ;;  %s259_s30 = scalar_lea.vmem [#allocation4], %s1382_s14 }
  0x4b   : > { %s266_s11 = sshll.u32 %s259_s30, 4  ;;  %p2058_p2 = pnand %p1551_p3, %p55_p5  ;;  %s2062_s11 = int_to_ptr.vmem [resolvable:$true] %s266_s11 }
  0x4c   : > { %s256_s15 = scalar_lea.sflag [#allocation5], %s255_s19  ;;  %s1697_s17 = scalar_lea.hbm %s2054_s28, 128 }
  0x4d   : > { %p1698_p11 = scmp.ne.s32.totalorder %s2054_s28, %s1697_s17  ;;  %p1699_p12 = pneg %p2058_p2 }
  0x4e   : > { %s1702_s10 = scalar_lea.hbm %s2283_s0, 256  ;;  %p1703_p4 = scmp.lt.u32.totalorder %s2054_s28, %s2283_s0 }
  0x4f   : > { %p1700_p0 = pnand %p1699_p12, %p1698_p11  ;;  %p1704_p13 = scmp.lt.u32.totalorder %s1702_s10, %s1697_s17 }
  0x50   : > { %p1706_p10 = scmp.lt.u32.totalorder %s1697_s17, %s2054_s28 }
  0x51   : > { %p1701_p1 = pneg %p1700_p0  ;;  %p1705_p6 = por %p1704_p13, %p1703_p4 }
  0x53   : > { %p1707_p3 = por %p1706_p10, %p1705_p6 }
  0x55   : > { %p1708_p5 = pnand %p1707_p3, %p1701_p1 }
  0x57   : > { %1711 = shalt.err (!%p1708_p5)
}
  0x58   : > { %s1712_s19 = scalar_lea.vmem %s2062_s11, 128  ;;  %s1851_s30 = smov [#allocation4]  }
  0x59   : > { %p1713_p9 = scmp.ne.s32.totalorder %s2062_s11, %s1712_s19  ;;  %s1717_s18 = sshll.u32 %s1851_s30, 4  ;;  %s1718_s18 = int_to_ptr.vmem [resolvable:$false] %s1717_s18 }
  0x5a   : > { %s1719_s14 = scalar_lea.vmem %s1718_s18, 256  ;;  %p1720_p7 = scmp.lt.s32.totalorder %s2062_s11, %s1718_s18 }
  0x5b   : > { %p1715_p11 = pnand %p1713_p9, %p1699_p12  ;;  %p1721_p4 = scmp.lt.s32.totalorder %s1719_s14, %s1712_s19 }
  0x5d   : > { %p1716_p0 = pneg %p1715_p11  ;;  %p1722_p13 = por %p1721_p4, %p1720_p7 }
  0x5f   : > { %p1723_p6 = pnand %p1722_p13, %p1716_p0 }
  0x61   : > { %1726 = shalt.err (!%p1723_p6)
}
  0x62   : > { %1541 = dma.hbm_to_vmem [thread:$0]  (!%p2058_p2), %s2054_s28, 128, %s2062_s11, %s256_s15  }
  0x63   : > { %275 = sbr.rel (%p1961_p8) target bundleno = 2128 (0x850), region = 40  ;;  %s2092_s17 = sand.u32 (!%p1961_p8), 1, %s1829_s22  }
  0x64   : > { %s1385_s10 = sshll.u32 (!%p1961_p8), %s2092_s17, 3  ;;  %s278_s20 = scalar_lea.sflag (!%p1961_p8), [#allocation5], %s2092_s17 }
  0x65   : > { %s281_s27 = scalar_lea.vmem (!%p1961_p8), [#allocation4], %s1385_s10  ;;  %p2304_p7 = scmp.ne.s32.totalorder (!%p1961_p8), %s2297_s7, 0 }
  0x6a   : > { %1808 = dma.done.wait (%p2304_p7), %s278_s20, 128  }
  0x6b   : > { %1810 = vsyncadd (%p2304_p7), %s278_s20, 4294967168  ;;  %p2305_p2 = scmp.ne.s32.totalorder %s2295_s29, 0 }
  0x6d   : > { %1812 = dma.done.wait (%p2305_p2), [#allocation8], 1024  }
  0x6e   : > { %1814 = vsyncadd (%p2305_p2), [#allocation8], 4294966272  ;;  %v1852_v0 = vmov 0.0|0.0   ;;  %vm1853_vm0 = vmmov 0   ;;  %v1854_v1 = vmov 0.0   ;;  %v328_v2 = vld [vmem:[#allocation7] sm:$0xff] }
  0x6f   : > { %1505 = vmatprep.subr.bf16.mxu0 %v1852_v0  ;;  %1451 = vmatprep.mubr.msk.f32.mxu0 %vm1853_vm0, %v1854_v1  ;;  %v329_v3 = vld [vmem:[#allocation7 + $0x8] sm:$0xff]  ;;  %v330_v4 = vld [vmem:[#allocation7 + $0x10] sm:$0xff]  ;;  %v331_v6 = vld [vmem:[#allocation7 + $0x18] sm:$0xff]  ;;  %vm339_vm1 = vcmask 261120   ;;  %vm413_vm2 = vcmask 785408   ;;  %s1855_s9 = smov 64  }
  0x70   : > { %1454 = vmatprep.subr.mxu1 %v1854_v1  ;;  %1456 = vmatprep.mubr.msk.f32.mxu1 %vm1853_vm0, %v1854_v1  ;;  %v1506_v5 = vpack.c.bf16 %v329_v3, %v328_v2  ;;  %v1509_v7 = vpack.c.bf16 %v331_v6, %v330_v4  ;;  %v327_v8 = vld [vmem:[%s281_s27] sm:$0xff]  ;;  %v1390_v9 = vld [vmem:[%s2285_s2] ss:$0 sm:$0xff]  ;;  %s1856_s28 = smov 96   ;;  %s1857_s11 = smov 88   ;;  %vm422_vm3 = vcmask 64512  }
  0x71   : > { %s1858_s8 = smov 120   ;;  %s1859_s15 = smov 80   ;;  %vm762_vm4 = vcmask 130112   ;;  %vm939_vm5 = vcmask 195712   ;;  %vm1116_vm6 = vcmask 261312  }
  0x72   : > { %1507 = vmatpush3.bf16.msra.mxu0 %v1506_v5  ;;  %s1860_s19 = smov 72   ;;  %s1861_s30 = smov 112  }
  0x73   : > { %1508 = vmatprep.subr.bf16.mxu0 %v1852_v0  ;;  %s1862_s18 = smov 104   ;;  %s1389_s14 = sshll.u32 %s2092_s17, 5 }
  0x74   : > { %s2150_s20 = scalar_lea.vmem [#allocation11], %s1389_s14  ;;  %s1863_s27 = smov 56  }
  0x75   : > { %s1864_s29 = smov 48   ;;  %s1865_s7 = smov 40  }
  0x76   : > { %1510 = vmatpush3.bf16.msra.mxu0 %v1509_v7  ;;  %s1211_s14 = scalar_lea.sflag [#allocation12], %s2092_s17  ;;  %p2306_p12 = scmp.ne.s32.totalorder %s2302_s12, 0 }
  0x77   : > { %1474 = vmatprep.subr.mxu0 %v1854_v1 }
  0x79   : > { %1452 = vmatmul.mubr.msk.f32.vlgmr.msra.gmra.mrb[0].mxu0 %vm339_vm1, %v327_v8 }
  0x7a   : > { %1476 = vmatprep.mubr.msk.f32.mxu0 %vm1853_vm0, %v1854_v1 }
 0x14c   : > { %v409_v10 = vpop.f32.mrb[0].mxu0 }
 0x14d   : > { %v410_v11 = vadd.f32 %v1390_v9, %v409_v10  ;;  %v1453_v12 = vpop.f32.mrb[1].mxu0  ;;  %v1119_v9 = vld [vmem:[#allocation9] sm:$0xff]  ;;  %v1120_v10 = vld [vmem:[#allocation9 + $0x8] sm:$0xff] }
 0x14e   : > { %v1121_v12 = vld [vmem:[#allocation9 + $0x10] sm:$0xff] }
 0x14f   : > { %414 = vst.msk [vmem:[#allocation2] sm:$0xff] %vm413_vm2, %v410_v11  ;;  %v1512_v11 = vpack.c.bf16 %v1120_v10, %v1119_v9 }
 0x156   : > { %v2120_v13 = vld [vmem:[#allocation2] sm:$0xff] }
 0x157   : > { %510 = vrot.lane.b32.xlu1 %v2120_v13, %s1855_s9  ;;  %420 = vrot.lane.b32.xlu0 %v2120_v13, %s1856_s28  ;;  %s1866_s9 = smov 8   ;;  %s1867_s28 = smov 16  }
 0x15b   : > { %593 = vrot.lane.b32.xlu1 %v2120_v13, %s1857_s11  ;;  %s1868_s11 = smov 24  }
 0x15f   : > { %590 = vrot.lane.b32.xlu1 %v2120_v13, %s1858_s8  ;;  %s1416_s8 = sshll.u32 %s1837_s24, 9 }
 0x163   : > { %770 = vrot.lane.b32.xlu1 %v2120_v13, %s1859_s15  ;;  %s1239_s15 = sshll.u32 %s2150_s20, 4  ;;  %s2197_s15 = int_to_ptr.vmem [resolvable:$true] %s1239_s15 }
 0x1c9   : > { %v511_v14 = vpop.permute.xlu1 %510  ;;  %v421_v15 = vpop.permute.xlu0 %420 }
 0x1ca   : > { %1455 = vmatpush3.xpose.msk.msra.mxu1 %vm422_vm3, %v421_v15 }
 0x1cb   : > { %1459 = vmatprep.subr.mxu1 %v1854_v1 }
 0x1cd   : > { %v594_v16 = vpop.permute.xlu1 %593  ;;  %1457 = vmatmul.mubr.msk.f32.vlgmr.msra.gmra.mrb[0].mxu1 %vm422_vm3, %v2120_v13 }
 0x1ce   : > { %1460 = vmatpush3.msra.mxu1 %v511_v14  ;;  %1461 = vmatprep.mubr.msk.f32.mxu1 %vm1853_vm0, %v1854_v1 }
 0x1cf   : > { %1464 = vmatprep.subr.mxu1 %v1854_v1 }
 0x1d1   : > { %v591_v17 = vpop.permute.xlu1 %590 }
 0x1d5   : > { %v771_v18 = vpop.permute.xlu1 %770 }
 0x1d6   : > { %1475 = vmatpush3.xpose.msk.msra.mxu0 %vm422_vm3, %v771_v18 }
 0x1d7   : > { %1484 = vmatprep.subr.mxu0 %v1854_v1 }
 0x2a0   : > { %v494_v19 = vpop.f32.mrb[0].mxu1 }
 0x2a1   : > { %v1458_v20 = vpop.f32.mrb[1].mxu1  ;;  %v498_v21 = vsel %vm422_vm3, %v494_v19, -inf }
 0x2a2   : > { %499 = vmax.xlane.f32.xlu0 %v498_v21 }
 0x2b8   : > { %947 = vrot.lane.b32.xlu0 %v2120_v13, %s1860_s19 }
 0x32f   : > { %v500_v22 = vpop.xlane.xlu0 %499 }
 0x330   : > { %v501_v23 = vsub.f32 %v494_v19, %v500_v22 }
 0x332   : > { %v502_v24 = vmul.f32 1.442695, %v501_v23 }
 0x333   : > { %v948_v29 = vpop.permute.xlu0 %947 }
 0x334   : > { %1625 = vpow2.f32 %v502_v24 }
 0x33e   : > { %v1626_v25 = vpop.eup %1625 }
 0x33f   : > { %v504_v26 = vsel %vm422_vm3, %v1626_v25, 0.0 }
 0x340   : > { %505 = vadd.xlane.f32.xlu1 %v504_v26 }
 0x351   : > { %767 = vrot.lane.b32.xlu1 %v2120_v13, %s1861_s30 }
 0x355   : > { %944 = vrot.lane.b32.xlu1 %v2120_v13, %s1862_s18  ;;  %s2195_s18 = scalar_lea.hbm %s2289_s6, %s1416_s8 }
 0x3cd   : > { %v506_v27 = vpop.xlane.xlu1 %505 }
 0x3ce   : > { %1627 = vrcp.f32 %v506_v27 }
 0x3d1   : > { %v768_v28 = vpop.permute.xlu1 %767 }
 0x3d2   : > { %1477 = vmatmul.mubr.msk.f32.vlgmr.msra.gmra.mrb[2].mxu0 %vm422_vm3, %v768_v28 }
 0x3d3   : > { %1485 = vmatpush3.xpose.msk.msra.mxu0 %vm422_vm3, %v948_v29  ;;  %1486 = vmatprep.mubr.msk.f32.mxu0 %vm1853_vm0, %v1854_v1 }
 0x3d4   : > { %1511 = vmatprep.subr.bf16.mxu0 %v1852_v0 }
 0x3d5   : > { %v945_v30 = vpop.permute.xlu1 %944 }
 0x3d6   : > { %1487 = vmatmul.mubr.msk.f32.vlgmr.msra.gmra.mrb[4].mxu0 %vm422_vm3, %v945_v30 }
 0x3d7   : > { %1502 = vmatprep.mubr.msk.f32.mxu0 %vm1853_vm0, %v1854_v1  ;;  %1513 = vmatpush3.bf16.msra.mxu0 %v1512_v11 }
 0x3d8   : > { %v1628_v31 = vpop.eup %1627  ;;  %1514 = vmatprep.subr.bf16.mxu0 %v1852_v0 }
 0x3d9   : > { %v508_v32 = vmul.f32 %v1628_v31, %v1626_v25 }
 0x3db   : > { %509 = vst.msk [vmem:[%s2150_s20] sm:$0xff] %vm422_vm3, %v508_v32  ;;  %1462 = vmatmul.mubr.msk.f32.vlgmr.msra.gmra.mrb[2].mxu1 %vm422_vm3, %v508_v32 }
 0x3dc   : > { %1465 = vmatpush3.xpose.msk.msra.mxu1 %vm422_vm3, %v594_v16  ;;  %1466 = vmatprep.mubr.msk.f32.mxu1 %vm1853_vm0, %v1854_v1 }
 0x3dd   : > { %1469 = vmatprep.subr.mxu1 %v1854_v1 }
 0x3df   : > { %1467 = vmatmul.mubr.msk.f32.vlgmr.msra.gmra.mrb[4].mxu1 %vm422_vm3, %v591_v17 }
 0x3e0   : > { %1471 = vmatprep.mubr.msk.f32.mxu1 %vm1853_vm0, %v1854_v1 }
 0x4a5   : > { %v842_v33 = vpop.f32.mrb[2].mxu0 }
 0x4a6   : > { %v1478_v34 = vpop.f32.mrb[3].mxu0  ;;  %v846_v35 = vsel %vm422_vm3, %v842_v33, -inf }
 0x4a7   : > { %847 = vmax.xlane.f32.xlu0 %v846_v35 }
 0x4a9   : > { %v1019_v36 = vpop.f32.mrb[4].mxu0 }
 0x4aa   : > { %v1488_v37 = vpop.f32.mrb[5].mxu0  ;;  %v1023_v43 = vsel %vm422_vm3, %v1019_v36, -inf }
 0x4ae   : > { %v582_v38 = vpop.f32.mrb[2].mxu1 }
 0x4af   : > { %586 = vst.msk [vmem:[#allocation3] sm:$0xff] %vm422_vm3, %v582_v38  ;;  %v1463_v39 = vpop.f32.mrb[3].mxu1 }
 0x4b2   : > { %v665_v40 = vpop.f32.mrb[4].mxu1 }
 0x4b3   : > { %v1468_v41 = vpop.f32.mrb[5].mxu1  ;;  %v669_v42 = vsel %vm422_vm3, %v665_v40, -inf }
 0x4b4   : > { %670 = vmax.xlane.f32.xlu1 %v669_v42 }
 0x4b8   : > { %1024 = vmax.xlane.f32.xlu1 %v1023_v43 }
 0x534   : > { %v848_v44 = vpop.xlane.xlu0 %847 }
 0x535   : > { %v849_v45 = vsub.f32 %v842_v33, %v848_v44 }
 0x537   : > { %v850_v46 = vmul.f32 1.442695, %v849_v45 }
 0x539   : > { %1629 = vpow2.f32 %v850_v46 }
 0x541   : > { %v671_v47 = vpop.xlane.xlu1 %670 }
 0x542   : > { %v672_v55 = vsub.f32 %v665_v40, %v671_v47 }
 0x543   : > { %v1630_v48 = vpop.eup %1629 }
 0x544   : > { %v852_v49 = vsel %vm422_vm3, %v1630_v48, 0.0  ;;  %v673_v56 = vmul.f32 1.442695, %v672_v55 }
 0x545   : > { %853 = vadd.xlane.f32.xlu1 %v852_v49  ;;  %v1025_v50 = vpop.xlane.xlu1 %1024 }
 0x546   : > { %v1026_v51 = vsub.f32 %v1019_v36, %v1025_v50 }
 0x548   : > { %v1027_v52 = vmul.f32 1.442695, %v1026_v51 }
 0x54a   : > { %1631 = vpow2.f32 %v1027_v52 }
 0x54b   : > { %1633 = vpow2.f32 %v673_v56 }
 0x554   : > { %v1632_v53 = vpop.eup %1631 }
 0x555   : > { %v1029_v54 = vsel %vm422_vm3, %v1632_v53, 0.0  ;;  %v1634_v57 = vpop.eup %1633 }
 0x556   : > { %682 = vrot.lane.b32.xlu1 %v2120_v13, %s1863_s27  ;;  %1030 = vadd.xlane.f32.xlu0 %v1029_v54  ;;  %v675_v58 = vsel %vm422_vm3, %v1634_v57, 0.0  ;;  %s1727_s27 = scalar_lea.vmem %s2197_s15, 512 }
 0x557   : > { %p1728_p8 = scmp.ne.s32.totalorder %s2197_s15, %s1727_s27 }
 0x559   : > { %p1729_p1 = pnand %p1728_p8, %p2306_p12 }
 0x55b   : > { %p1730_p10 = pneg %p1729_p1 }
 0x56c   : > { %859 = vrot.lane.b32.xlu0 %v2120_v13, %s1864_s29  ;;  %s1869_s29 = smov [#allocation11]  }
 0x57a   : > { %676 = vadd.xlane.f32.xlu1 %v675_v58 }
 0x58b   : > { %1036 = vrot.lane.b32.xlu1 %v2120_v13, %s1865_s7  ;;  %v1122_v13 = vld [vmem:[#allocation9 + $0x18] sm:$0xff]  ;;  %s1731_s7 = sshll.u32 %s1869_s29, 4  ;;  %s1732_s7 = int_to_ptr.vmem [resolvable:$false] %s1731_s7 }
 0x58c   : > { %v1515_v14 = vpack.c.bf16 %v1122_v13, %v1121_v12  ;;  %p1734_p3 = scmp.lt.s32.totalorder %s2197_s15, %s1732_s7 }
 0x58e   : > { %1516 = vmatpush3.bf16.msra.mxu0 %v1515_v14 }
 0x5d2   : > { %v854_v59 = vpop.xlane.xlu1 %853 }
 0x5d3   : > { %1635 = vrcp.f32 %v854_v59 }
 0x5d6   : > { %v683_v60 = vpop.permute.xlu1 %682 }
 0x5d7   : > { %1470 = vmatpush3.msra.mxu1 %v683_v60 }
 0x5d8   : > { %1479 = vmatprep.subr.mxu1 %v1854_v1 }
 0x5dd   : > { %v1636_v61 = vpop.eup %1635 }
 0x5de   : > { %v856_v62 = vmul.f32 %v1636_v61, %v1630_v48 }
 0x5e0   : > { %1401 = vst.msk [vmem:[%s2150_s20 + $0x10] sm:$0xff] %vm422_vm3, %v856_v62 }
 0x5e3   : > { %v1031_v63 = vpop.xlane.xlu0 %1030 }
 0x5e4   : > { %1637 = vrcp.f32 %v1031_v63 }
 0x5e7   : > { %v860_v7 = vpop.permute.xlu0 %859 }
 0x5ee   : > { %v1638_v2 = vpop.eup %1637 }
 0x5ef   : > { %v1033_v3 = vmul.f32 %v1638_v2, %v1632_v53 }
 0x5f1   : > { %1405 = vst.msk [vmem:[%s2150_s20 + $0x18] sm:$0xff] %vm422_vm3, %v1033_v3 }
 0x607   : > { %v677_v4 = vpop.xlane.xlu1 %676 }
 0x608   : > { %1639 = vrcp.f32 %v677_v4 }
 0x60b   : > { %v1037_v8 = vpop.permute.xlu1 %1036 }
 0x612   : > { %v1640_v5 = vpop.eup %1639 }
 0x613   : > { %v679_v6 = vmul.f32 %v1640_v5, %v1634_v57 }
 0x615   : > { %1397 = vst.msk [vmem:[%s2150_s20 + $0x8] sm:$0xff] %vm422_vm3, %v679_v6  ;;  %1472 = vmatmul.mubr.msk.f32.vlgmr.msra.gmra.mrb[6].mxu1 %vm422_vm3, %v679_v6  ;;  %s1733_s20 = scalar_lea.vmem %s1732_s7, 1024 }
 0x616   : > { %1480 = vmatpush3.msra.mxu1 %v860_v7  ;;  %1481 = vmatprep.mubr.msk.f32.mxu1 %vm1853_vm0, %v1854_v1  ;;  %p1735_p5 = scmp.lt.s32.totalorder %s1733_s20, %s1727_s27 }
 0x617   : > { %1489 = vmatprep.subr.mxu1 %v1854_v1 }
 0x618   : > { %p1736_p9 = por %p1735_p5, %p1734_p3 }
 0x619   : > { %1482 = vmatmul.mubr.msk.f32.vlgmr.msra.gmra.mrb[8].mxu1 %vm422_vm3, %v856_v62 }
 0x61a   : > { %1490 = vmatpush3.msra.mxu1 %v1037_v8  ;;  %1491 = vmatprep.mubr.msk.f32.mxu1 %vm1853_vm0, %v1854_v1  ;;  %p1737_p11 = pnand %p1736_p9, %p1730_p10 }
 0x61d   : > { %1492 = vmatmul.mubr.msk.f32.vlgmr.msra.gmra.mrb[10].mxu1 %vm422_vm3, %v1033_v3 }
 0x6e8   : > { %v754_v15 = vpop.f32.mrb[6].mxu1 }
 0x6e9   : > { %759 = vrot.lane.b32.xlu1 %v754_v15, %s1866_s9  ;;  %v1473_v16 = vpop.f32.mrb[7].mxu1 }
 0x6ec   : > { %v931_v17 = vpop.f32.mrb[8].mxu1 }
 0x6ed   : > { %936 = vrot.lane.b32.xlu0 %v931_v17, %s1867_s28  ;;  %v1483_v1 = vpop.f32.mrb[9].mxu1 }
 0x6f0   : > { %v1108_v18 = vpop.f32.mrb[10].mxu1 }
 0x6f1   : > { %1113 = vrot.lane.b32.xlu1 %v1108_v18, %s1868_s11  ;;  %v1493_v19 = vpop.f32.mrb[11].mxu1 }
 0x75b   : > { %v760_v20 = vpop.permute.xlu1 %759 }
 0x75c   : > { %763 = vst.msk [vmem:[#allocation3] sm:$0xff] %vm762_vm4, %v760_v20 }
 0x75f   : > { %v937_v0 = vpop.permute.xlu0 %936 }
 0x760   : > { %940 = vst.msk [vmem:[#allocation3] sm:$0xff] %vm939_vm5, %v937_v0 }
 0x763   : > { %v1114_v21 = vpop.permute.xlu1 %1113 }
 0x764   : > { %1117 = vst.msk [vmem:[#allocation3] sm:$0xff] %vm1116_vm6, %v1114_v21 }
 0x76b   : > { %v1118_v22 = vld [vmem:[#allocation3] sm:$0xff] }
 0x76c   : > { %1503 = vmatmul.mubr.msk.f32.vlgmr.msra.gmra.mrb[6].mxu0 %vm339_vm1, %v1118_v22 }
 0x76d   : > { %1740 = shalt.err (!%p1737_p11)
}
 0x76e   : > { %s1741_s28 = scalar_lea.hbm %s2195_s18, 512  ;;  %s1745_s19 = scalar_lea.hbm %s2289_s6, 1024 }
 0x76f   : > { %p1742_p0 = scmp.ne.s32.totalorder %s2195_s18, %s1741_s28  ;;  %p1746_p6 = scmp.lt.u32.totalorder %s2195_s18, %s2289_s6 }
 0x770   : > { %p1747_p7 = scmp.lt.u32.totalorder %s1745_s19, %s1741_s28  ;;  %p1749_p8 = scmp.lt.u32.totalorder %s1741_s28, %s2195_s18 }
 0x771   : > { %p1743_p4 = pnand %p1742_p0, %p2306_p12 }
 0x772   : > { %p1748_p2 = por %p1747_p7, %p1746_p6 }
 0x773   : > { %p1744_p13 = pneg %p1743_p4 }
 0x774   : > { %p1750_p1 = por %p1749_p8, %p1748_p2 }
 0x776   : > { %p1751_p10 = pnand %p1750_p1, %p1744_p13 }
 0x778   : > { %1754 = shalt.err (!%p1751_p10)
}
 0x779   : > { %s1870_s27 = smov 128   ;;  %v1407_v23 = vld [vmem:[%s2287_s4] ss:$0 sm:$0xff]  ;;  %s1411_s28 = sshll.u32 %s1837_s24, 7 }
 0x77a   : > { %1528 = dma.vmem_to_hbm [thread:$0]  (%p2306_p12), %s2197_s15, 512, %s2195_s18, %s1211_s14, %s1870_s27, %s1870_s27, %s1866_s9  }
 0x77b   : > { %s315_s11 = scalar_lea.vmem [#allocation10], %s1385_s10  ;;  %s2233_s29 = scalar_lea.hbm %s2288_s5, %s1411_s28 }
 0x77c   : > { %s1225_s8 = sshll.u32 %s315_s11, 4  ;;  %s1206_s9 = scalar_lea.sflag [#allocation6], %s2092_s17  ;;  %s2235_s8 = int_to_ptr.vmem [resolvable:$true] %s1225_s8 }
 0x77d   : > { %s1755_s24 = scalar_lea.vmem %s2235_s8, 128  ;;  %s1871_s10 = smov [#allocation10]  }
 0x77e   : > { %p1756_p3 = scmp.ne.s32.totalorder %s2235_s8, %s1755_s24  ;;  %s1759_s15 = sshll.u32 %s1871_s10, 4  ;;  %s1760_s15 = int_to_ptr.vmem [resolvable:$false] %s1759_s15 }
 0x77f   : > { %s1761_s18 = scalar_lea.vmem %s1760_s15, 256  ;;  %p1762_p11 = scmp.lt.s32.totalorder %s2235_s8, %s1760_s15 }
 0x780   : > { %p1757_p5 = pnand %p1756_p3, %p2306_p12  ;;  %p1763_p0 = scmp.lt.s32.totalorder %s1761_s18, %s1755_s24 }
 0x782   : > { %p1758_p9 = pneg %p1757_p5  ;;  %p1764_p4 = por %p1763_p0, %p1762_p11 }
 0x784   : > { %p1765_p13 = pnand %p1764_p4, %p1758_p9 }
 0x83f   : > { %v1200_v24 = vpop.f32.mrb[6].mxu0 }
 0x840   : > { %v1201_v25 = vadd.f32 %v1407_v23, %v1200_v24  ;;  %v1504_v26 = vpop.f32.mrb[7].mxu0 }
 0x842   : > { %1204 = vst.msk [vmem:[%s315_s11] sm:$0xff] %vm339_vm1, %v1201_v25 }
 0x843   : > { %1768 = shalt.err (!%p1765_p13)
}
 0x844   : > { %s1769_s17 = scalar_lea.hbm %s2233_s29, 128  ;;  %s1773_s7 = scalar_lea.hbm %s2288_s5, 256 }
 0x845   : > { %p1770_p6 = scmp.ne.s32.totalorder %s2233_s29, %s1769_s17  ;;  %p1774_p8 = scmp.lt.u32.totalorder %s2233_s29, %s2288_s5 }
 0x846   : > { %p1775_p1 = scmp.lt.u32.totalorder %s1773_s7, %s1769_s17  ;;  %p1777_p3 = scmp.lt.u32.totalorder %s1769_s17, %s2233_s29 }
 0x847   : > { %p1771_p7 = pnand %p1770_p6, %p2306_p12 }
 0x848   : > { %p1776_p10 = por %p1775_p1, %p1774_p8 }
 0x849   : > { %p1772_p2 = pneg %p1771_p7 }
 0x84a   : > { %p1778_p5 = por %p1777_p3, %p1776_p10 }
 0x84c   : > { %p1779_p9 = pnand %p1778_p5, %p1772_p2 }
 0x84e   : > { %1782 = shalt.err (!%p1779_p9)
}
 0x84f   : > { %1527 = dma.vmem_to_hbm [thread:$0]  (%p2306_p12), %s2235_s8, 128, %s2233_s29, %s1206_s9  }
 0x850 PF: > { %s2307_s11 = sld [smem:[#allocation17_spill]]  ;;  %s1254_s19 = sand.u32 1, %s1825_s21  }
 0x851   : > { %p2309_p0 = scmp.ge.s32.totalorder %s1845_s26, 2  ;;  %s1255_s30 = scalar_lea.sflag [#allocation6], %s1254_s19 }
 0x856   : > { %p2308_p11 = scmp.ne.s32.totalorder %s2307_s11, 0 }
 0x858   : > { %p1543_p4 = pnand %p2309_p0, %p2308_p11 }
 0x85a   : > { %1816 = dma.done.wait (!%p1543_p4), %s1255_s30, 128  }
 0x85b   : > { %1818 = vsyncadd (!%p1543_p4), %s1255_s30, 4294967168  ;;  %s1264_s24 = scalar_lea.sflag [#allocation12], %s1254_s19 }
 0x85c   : > { %1820 = dma.done.wait (!%p1543_p4), %s1264_s24, 512  }
 0x85d   : > { %1822 = vsyncadd (!%p1543_p4), %s1264_s24, 4294966784  ;;  %s27_s26 = sadd.s32 1, %s1845_s26   ;;  %s2310_s21 = smov %s1829_s22 }
 0x85e   : > { %p24_p13 = scmp.ge.s32.totalorder %s27_s26, 4   ;;  %s2311_s22 = smov %s1833_s23 }
 0x85f   : > { %s2312_s23 = smov %s2049_s13  ;;  %s2313_s24 = smov %s1841_s25 }
 0x860   : > { %s2314_s25 = smov %s2316_s16  ;;  %26 = sbr.rel (!%p24_p13) target bundleno = 9 (0x9), region = 118 }
 0x867   :  { %1269 = vsyncpa [#allocation5], 1 }
 0x868   :  { %1271 = vsyncpa [#allocation5 + $0x1], 1 }
 0x869   :  { %1272 = vsyncpa [#allocation8], 1 }
 0x86a   :  { %1273 = vsyncpa [#allocation6], 1 }
 0x86b   :  { %1275 = vsyncpa [#allocation6 + $0x1], 1 }
 0x86c   :  { %1276 = vsyncpa [#allocation12], 1 }
 0x86d   :  { %1278 = vsyncpa [#allocation12 + $0x1], 1 }

</bundles_post_ra>
